<compile_context>
chip_gen: v5e
topology: v5e:2x2
jax: 0.10.0
libtpu: 0.0.40
codegen_flags: <defaults>
</compile_context>

<pallas_src>
import functools

import numpy as np
import jax
import jax.numpy as jnp
from jax.experimental import pallas as pl
from jax.experimental.pallas import tpu as pltpu

NEG_SLOPE = 0.01  # PyTorch LeakyReLU default


def _leaky(x):
    return jnp.where(x > 0, x, NEG_SLOPE * x)


def _round_up(n, m):
    return (n + m - 1) // m * m


# ------------------------------ fused kernel ---------------------------------
def _fused_cnn_kernel(x_ref, w1_ref, w2_ref, w3_ref, wfc1_ref, wfc2_ref,
                      wout_ref, bias_ref, o_ref):
    f32 = jnp.float32

    # fc1 pre-activation, lane-packed: branch br occupies lanes [32*br, 32*br+32).
    f1 = bias_ref[3:4, 0:96]                                     # (1, 96)

    # Three branches share all conv/fc1 weights; static 3x unroll, all SSA values.
    for br in range(3):
        h = x_ref[br]                                            # (Bt, 9) raw image
        h = _leaky(jnp.dot(h, w1_ref[...], preferred_element_type=f32)
                   + bias_ref[0:1, 0:256])                       # conv1 -> (Bt, 256)
        h = _leaky(jnp.dot(h, w2_ref[...], preferred_element_type=f32)
                   + bias_ref[1:2, 0:288])                       # conv2 -> (Bt, 288)
        h = _leaky(jnp.dot(h, w3_ref[...], preferred_element_type=f32)
                   + bias_ref[2:3, 0:64])                        # conv3 -> (Bt, 64)
        # fc1 with the NCHW-flatten permutation folded in; result is already
        # placed at this branch's lane offset (zero-padded weight), so the sum
        # over branches is exactly torch.cat((x, y, z), dim=1) after fc1.
        f1 = f1 + jnp.dot(h, wfc1_ref[br], preferred_element_type=f32)

    f1 = _leaky(f1)                                              # (Bt, 96)
    h = jnp.dot(f1, wfc2_ref[...], preferred_element_type=f32) + bias_ref[4:5, 0:64]
    out = jnp.dot(h, wout_ref[...], preferred_element_type=f32) + bias_ref[5:6, 0:7]
    o_ref[...] = out.astype(o_ref.dtype)


# ------------------------------ forward pass ----------------------------------
@functools.partial(jax.jit, static_argnums=(4,))
def _cnn_forward_jit(prep, x, y, z, block_b):
    B = x.shape[0]
    bt = min(block_b, _round_up(B, 8))       # batch-tile (multiple of 8 sublanes)
    Bp = _round_up(B, bt)

    # Host prep is only reshape/stack/pad of the raw 3x3 images: (3, Bp, 9).
    inp = jnp.stack([x.reshape(B, 9), y.reshape(B, 9), z.reshape(B, 9)], axis=0)
    if Bp != B:
        inp = jnp.pad(inp, ((0, 0), (0, Bp - B), (0, 0)))

    out = pl.pallas_call(
        _fused_cnn_kernel,
        out_shape=jax.ShapeDtypeStruct((Bp, 7), jnp.float32),
        grid=(Bp // bt,),
        in_specs=[
            pl.BlockSpec((3, bt, 9), lambda i: (0, i, 0)),    # raw images (pipelined)
            pl.BlockSpec((9, 256), lambda i: (0, 0)),         # conv1 "big" weight
            pl.BlockSpec((256, 288), lambda i: (0, 0)),       # conv2 "big" weight
            pl.BlockSpec((288, 64), lambda i: (0, 0)),        # conv3 "big" weight
            pl.BlockSpec((3, 64, 96), lambda i: (0, 0, 0)),   # fc1 (lane-packed/branch)
            pl.BlockSpec((96, 64), lambda i: (0, 0)),         # fc2 weight (transposed)
            pl.BlockSpec((64, 7), lambda i: (0, 0)),          # output weight (transposed)
            pl.BlockSpec((8, 288), lambda i: (0, 0)),         # packed biases
        ],
        out_specs=pl.BlockSpec((bt, 7), lambda i: (i, 0)),
        compiler_params=pltpu.CompilerParams(
            dimension_semantics=("parallel",),                # megacore / v7x sharding
            vmem_limit_bytes=32 * 1024 * 1024),
    )(inp, prep["w1"], prep["w2"], prep["w3"], prep["wfc1"],
      prep["wfc2"], prep["wout"], prep["bias"])
    return out[:B]


def cnn_forward(prep, x, y, z, block_b=128):
    """Fused forward of the PyTorch CNN.  x, y, z: (B, 1, 3, 3) NCHW float32."""
    return _cnn_forward_jit(prep, x, y, z, block_b)


# ------------------------------- parameters -----------------------------------
def init_params(key):
    """Random parameters in the PyTorch module's native layouts."""
    ks = jax.random.split(key, 12)

    def w(k, shape, scale=0.1):
        return (scale * jax.random.normal(k, shape)).astype(jnp.float32)

    return {
        "conv1_w": w(ks[0], (16, 1, 2, 2)),  "conv1_b": w(ks[1], (16,)),
        "conv2_w": w(ks[2], (32, 16, 2, 2)), "conv2_b": w(ks[3], (32,)),
        "conv3_w": w(ks[4], (16, 32, 2, 2)), "conv3_b": w(ks[5], (16,)),
        "fc1_w": w(ks[6], (32, 64)),         "fc1_b": w(ks[7], (32,)),
        "fc2_w": w(ks[8], (64, 96)),         "fc2_b": w(ks[9], (64,)),
        "out_w": w(ks[10], (7, 64)),         "out_b": w(ks[11], (7,)),
    }


def prepare_params(p):
    """One-time repack of torch-layout params into matmul-ready layouts.

    Activations use lane index pos*C + c (pos in row-major spatial order), so
    each conv layer is a single dense matmul against a block-sparse "big"
    weight; padding and im2col are folded into the conv1 weight.
    """
    # conv1: raw 9-pixel image -> (4x4, 16ch) canvas; pad=1 folded in.
    w1 = np.asarray(p["conv1_w"], np.float32)                    # (16, 1, 2, 2)
    W1 = np.zeros((9, 256), np.float32)
    for ph in range(4):
        for pw in range(4):
            pos = ph * 4 + pw
            for kh in range(2):
                for kw in range(2):
                    h, w_ = ph + kh - 1, pw + kw - 1
                    if 0 <= h < 3 and 0 <= w_ < 3:
                        W1[h * 3 + w_, pos * 16:(pos + 1) * 16] += w1[:, 0, kh, kw]

    # conv2: (4x4, 16ch) -> (3x3, 32ch).
    w2 = np.asarray(p["conv2_w"], np.float32)                    # (32, 16, 2, 2)
    W2 = np.zeros((256, 288), np.float32)
    for oh in range(3):
        for ow in range(3):
            op = oh * 3 + ow
            for kh in range(2):
                for kw in range(2):
                    ip = (oh + kh) * 4 + (ow + kw)
                    W2[ip * 16:(ip + 1) * 16, op * 32:(op + 1) * 32] += w2[:, :, kh, kw].T

    # conv3: (3x3, 32ch) -> (2x2, 16ch).
    w3 = np.asarray(p["conv3_w"], np.float32)                    # (16, 32, 2, 2)
    W3 = np.zeros((288, 64), np.float32)
    for oh in range(2):
        for ow in range(2):
            op = oh * 2 + ow
            for kh in range(2):
                for kw in range(2):
                    ip = (oh + kh) * 3 + (ow + kw)
                    W3[ip * 32:(ip + 1) * 32, op * 16:(op + 1) * 16] += w3[:, :, kh, kw].T

    # fc1: consumes torch's NCHW flatten (index c*4 + pos); permute to our
    # pos*16 + c layout, then lane-pack per branch at offset 32*br so the sum
    # over branches is directly the fc2 input cat((x, y, z), dim=1).
    fc1_w = np.asarray(p["fc1_w"], np.float32)                   # (32, 64)
    Wp = np.zeros((64, 32), np.float32)
    for op in range(4):
        for c in range(16):
            Wp[op * 16 + c, :] = fc1_w[:, c * 4 + op]
    Wfc1 = np.zeros((3, 64, 96), np.float32)
    for br in range(3):
        Wfc1[br, :, br * 32:(br + 1) * 32] = Wp

    Wfc2 = np.asarray(p["fc2_w"], np.float32).T                  # (96, 64)
    Wout = np.asarray(p["out_w"], np.float32).T                  # (64, 7)

    # Biases packed into one small block; conv/fc1 biases tiled per position.
    bias = np.zeros((8, 288), np.float32)
    bias[0, :256] = np.tile(np.asarray(p["conv1_b"], np.float32), 16)
    bias[1, :288] = np.tile(np.asarray(p["conv2_b"], np.float32), 9)
    bias[2, :64] = np.tile(np.asarray(p["conv3_b"], np.float32), 4)
    bias[3, :96] = np.tile(np.asarray(p["fc1_b"], np.float32), 3)
    bias[4, :64] = np.asarray(p["fc2_b"], np.float32)
    bias[5, :7] = np.asarray(p["out_b"], np.float32)

    return {"w1": jnp.asarray(W1), "w2": jnp.asarray(W2), "w3": jnp.asarray(W3),
            "wfc1": jnp.asarray(Wfc1), "wfc2": jnp.asarray(Wfc2),
            "wout": jnp.asarray(Wout), "bias": jnp.asarray(bias)}


# ------------------------------ pure-JAX reference ----------------------------
def _ref_conv_leaky(x, w, b, padding):
    y = jax.lax.conv_general_dilated(
        x, w, window_strides=(1, 1),
        padding=((padding, padding), (padding, padding)),
        dimension_numbers=("NCHW", "OIHW", "NCHW"),
        precision=jax.lax.Precision.HIGHEST)
    y = y + b.reshape(1, -1, 1, 1)
    return jnp.where(y > 0, y, NEG_SLOPE * y)


def reference_forward(p, x, y, z):
    """Direct transcription of the PyTorch forward (validation only)."""
    hp = jax.lax.Precision.HIGHEST

    def branch(t):
        t = _ref_conv_leaky(t, p["conv1_w"], p["conv1_b"], 1)
        t = _ref_conv_leaky(t, p["conv2_w"], p["conv2_b"], 0)
        t = _ref_conv_leaky(t, p["conv3_w"], p["conv3_b"], 0)
        t = t.reshape(t.shape[0], -1)                            # NCHW flatten
        t = jnp.dot(t, p["fc1_w"].T, precision=hp) + p["fc1_b"]
        return jnp.where(t > 0, t, NEG_SLOPE * t)

    cat = jnp.concatenate([branch(x), branch(y), branch(z)], axis=1)
    h = jnp.dot(cat, p["fc2_w"].T, precision=hp) + p["fc2_b"]
    return jnp.dot(h, p["out_w"].T, precision=hp) + p["out_b"]


if __name__ == "__main__":
    key = jax.random.PRNGKey(0)
    kx, ky, kz, kp, kq = jax.random.split(key, 5)
    # Spatial must be 3x3: conv1(pad=1)->4x4, conv2->3x3, conv3->2x2 so that the
    # NCHW flatten is 16*2*2 = 64 = fc1's expected input width.
    B = 2
    x = jax.random.normal(kx, (B, 1, 3, 3), dtype=jnp.float32)
    y = jax.random.normal(ky, (B, 1, 3, 3), dtype=jnp.float32)
    z = jax.random.normal(kz, (B, 1, 3, 3), dtype=jnp.float32)
    torch_params = init_params(kp)
    prep = prepare_params(torch_params)

    out = jax.block_until_ready(cnn_forward(prep, x, y, z))
    assert out.shape == (B, 7), out.shape
    ref = jax.block_until_ready(reference_forward(torch_params, x, y, z))
    assert jnp.allclose(out, ref, atol=5e-3, rtol=5e-2), (out, ref)

    # Multi-tile check: exercises the batch grid + padding path (grid of 3).
    B2 = 20
    xyz2 = jax.random.normal(kq, (3, B2, 1, 3, 3), dtype=jnp.float32)
    out2 = jax.block_until_ready(
        cnn_forward(prep, xyz2[0], xyz2[1], xyz2[2], block_b=8))
    ref2 = jax.block_until_ready(
        reference_forward(torch_params, xyz2[0], xyz2[1], xyz2[2]))
    assert out2.shape == (B2, 7), out2.shape
    assert jnp.allclose(out2, ref2, atol=5e-3, rtol=5e-2), (out2, ref2)

    print("KERNEL_OK")
</pallas_src>

<mosaic_0001>
module attributes {stable_mosaic.version = 11 : i64} {
  func.func @_fused_cnn_kernel(%arg0: i32, %arg1: memref<3x8x9xf32, #tpu.memory_space<vmem>>, %arg2: memref<9x256xf32, #tpu.memory_space<vmem>>, %arg3: memref<256x288xf32, #tpu.memory_space<vmem>>, %arg4: memref<288x64xf32, #tpu.memory_space<vmem>>, %arg5: memref<3x64x96xf32, #tpu.memory_space<vmem>>, %arg6: memref<96x64xf32, #tpu.memory_space<vmem>>, %arg7: memref<64x7xf32, #tpu.memory_space<vmem>>, %arg8: memref<8x288xf32, #tpu.memory_space<vmem>>, %arg9: memref<8x7xf32, #tpu.memory_space<vmem>>) attributes {dimension_semantics = [#tpu.dimension_semantics<parallel>], iteration_bounds = array<i64: 1>, scalar_prefetch = 0 : i64, scratch_operands = 0 : i64, tpu.core_type = #tpu.core_type<tc>, window_params = [{transform_indices = @transform_0, window_bounds = array<i64: 3, 8, 9>}, {pipeline_mode = #tpu.pipeline_mode<synchronous>, transform_indices = @transform_1, window_bounds = array<i64: 9, 256>}, {pipeline_mode = #tpu.pipeline_mode<synchronous>, transform_indices = @transform_2, window_bounds = array<i64: 256, 288>}, {pipeline_mode = #tpu.pipeline_mode<synchronous>, transform_indices = @transform_3, window_bounds = array<i64: 288, 64>}, {pipeline_mode = #tpu.pipeline_mode<synchronous>, transform_indices = @transform_4, window_bounds = array<i64: 3, 64, 96>}, {pipeline_mode = #tpu.pipeline_mode<synchronous>, transform_indices = @transform_5, window_bounds = array<i64: 96, 64>}, {pipeline_mode = #tpu.pipeline_mode<synchronous>, transform_indices = @transform_6, window_bounds = array<i64: 64, 7>}, {pipeline_mode = #tpu.pipeline_mode<synchronous>, transform_indices = @transform_7, window_bounds = array<i64: 8, 288>}, {transform_indices = @transform_8, window_bounds = array<i64: 8, 7>}]} {
    %c3 = arith.constant 3 : index
    %c0 = arith.constant 0 : index
    %0 = vector.load %arg8[%c3, %c0] : memref<8x288xf32, #tpu.memory_space<vmem>>, vector<1x96xf32>
    %c0_0 = arith.constant 0 : index
    %c0_1 = arith.constant 0 : index
    %c0_2 = arith.constant 0 : index
    %1 = vector.load %arg1[%c0_0, %c0_1, %c0_2] : memref<3x8x9xf32, #tpu.memory_space<vmem>>, vector<1x8x9xf32>
    %2 = vector.shape_cast %1 : vector<1x8x9xf32> to vector<8x9xf32>
    %c0_3 = arith.constant 0 : index
    %c0_4 = arith.constant 0 : index
    %3 = vector.load %arg2[%c0_3, %c0_4] : memref<9x256xf32, #tpu.memory_space<vmem>>, vector<9x256xf32>
    %cst = arith.constant dense<0.000000e+00> : vector<8x256xf32>
    %4 = tpu.matmul %2, %3, %cst {dimension_numbers = #tpu.dot_dimension_numbers<[1], [0], [0], [1], [0, 0, 1, 1], [], []>} : vector<8x9xf32>, vector<9x256xf32>, vector<8x256xf32> -> vector<8x256xf32>
    %c0_5 = arith.constant 0 : index
    %c0_6 = arith.constant 0 : index
    %5 = vector.load %arg8[%c0_5, %c0_6] : memref<8x288xf32, #tpu.memory_space<vmem>>, vector<1x256xf32>
    %6 = vector.broadcast %5 : vector<1x256xf32> to vector<8x256xf32>
    %7 = arith.addf %4, %6 : vector<8x256xf32>
    %cst_7 = arith.constant 0.000000e+00 : f32
    %8 = vector.broadcast %cst_7 : f32 to vector<8x256xf32>
    %9 = arith.cmpf ogt, %7, %8 : vector<8x256xf32>
    %cst_8 = arith.constant 0.00999999977 : f32
    %10 = vector.broadcast %cst_8 : f32 to vector<8x256xf32>
    %11 = arith.mulf %10, %7 : vector<8x256xf32>
    %12 = arith.select %9, %7, %11 : vector<8x256xi1>, vector<8x256xf32>
    %c0_9 = arith.constant 0 : index
    %c0_10 = arith.constant 0 : index
    %13 = vector.load %arg3[%c0_9, %c0_10] : memref<256x288xf32, #tpu.memory_space<vmem>>, vector<256x288xf32>
    %cst_11 = arith.constant dense<0.000000e+00> : vector<8x288xf32>
    %14 = tpu.matmul %12, %13, %cst_11 {dimension_numbers = #tpu.dot_dimension_numbers<[1], [0], [0], [1], [0, 0, 1, 1], [], []>} : vector<8x256xf32>, vector<256x288xf32>, vector<8x288xf32> -> vector<8x288xf32>
    %c1 = arith.constant 1 : index
    %c0_12 = arith.constant 0 : index
    %15 = vector.load %arg8[%c1, %c0_12] : memref<8x288xf32, #tpu.memory_space<vmem>>, vector<1x288xf32>
    %16 = vector.broadcast %15 : vector<1x288xf32> to vector<8x288xf32>
    %17 = arith.addf %14, %16 : vector<8x288xf32>
    %cst_13 = arith.constant 0.000000e+00 : f32
    %18 = vector.broadcast %cst_13 : f32 to vector<8x288xf32>
    %19 = arith.cmpf ogt, %17, %18 : vector<8x288xf32>
    %cst_14 = arith.constant 0.00999999977 : f32
    %20 = vector.broadcast %cst_14 : f32 to vector<8x288xf32>
    %21 = arith.mulf %20, %17 : vector<8x288xf32>
    %22 = arith.select %19, %17, %21 : vector<8x288xi1>, vector<8x288xf32>
    %c0_15 = arith.constant 0 : index
    %c0_16 = arith.constant 0 : index
    %23 = vector.load %arg4[%c0_15, %c0_16] : memref<288x64xf32, #tpu.memory_space<vmem>>, vector<288x64xf32>
    %cst_17 = arith.constant dense<0.000000e+00> : vector<8x64xf32>
    %24 = tpu.matmul %22, %23, %cst_17 {dimension_numbers = #tpu.dot_dimension_numbers<[1], [0], [0], [1], [0, 0, 1, 1], [], []>} : vector<8x288xf32>, vector<288x64xf32>, vector<8x64xf32> -> vector<8x64xf32>
    %c2 = arith.constant 2 : index
    %c0_18 = arith.constant 0 : index
    %25 = vector.load %arg8[%c2, %c0_18] : memref<8x288xf32, #tpu.memory_space<vmem>>, vector<1x64xf32>
    %26 = vector.broadcast %25 : vector<1x64xf32> to vector<8x64xf32>
    %27 = arith.addf %24, %26 : vector<8x64xf32>
    %cst_19 = arith.constant 0.000000e+00 : f32
    %28 = vector.broadcast %cst_19 : f32 to vector<8x64xf32>
    %29 = arith.cmpf ogt, %27, %28 : vector<8x64xf32>
    %cst_20 = arith.constant 0.00999999977 : f32
    %30 = vector.broadcast %cst_20 : f32 to vector<8x64xf32>
    %31 = arith.mulf %30, %27 : vector<8x64xf32>
    %32 = arith.select %29, %27, %31 : vector<8x64xi1>, vector<8x64xf32>
    %c0_21 = arith.constant 0 : index
    %c0_22 = arith.constant 0 : index
    %c0_23 = arith.constant 0 : index
    %33 = vector.load %arg5[%c0_21, %c0_22, %c0_23] : memref<3x64x96xf32, #tpu.memory_space<vmem>>, vector<1x64x96xf32>
    %34 = vector.shape_cast %33 : vector<1x64x96xf32> to vector<64x96xf32>
    %cst_24 = arith.constant dense<0.000000e+00> : vector<8x96xf32>
    %35 = tpu.matmul %32, %34, %cst_24 {dimension_numbers = #tpu.dot_dimension_numbers<[1], [0], [0], [1], [0, 0, 1, 1], [], []>} : vector<8x64xf32>, vector<64x96xf32>, vector<8x96xf32> -> vector<8x96xf32>
    %36 = vector.broadcast %0 : vector<1x96xf32> to vector<8x96xf32>
    %37 = arith.addf %36, %35 : vector<8x96xf32>
    %c1_25 = arith.constant 1 : index
    %c0_26 = arith.constant 0 : index
    %c0_27 = arith.constant 0 : index
    %38 = vector.load %arg1[%c1_25, %c0_26, %c0_27] : memref<3x8x9xf32, #tpu.memory_space<vmem>>, vector<1x8x9xf32>
    %39 = vector.shape_cast %38 : vector<1x8x9xf32> to vector<8x9xf32>
    %c0_28 = arith.constant 0 : index
    %c0_29 = arith.constant 0 : index
    %40 = vector.load %arg2[%c0_28, %c0_29] : memref<9x256xf32, #tpu.memory_space<vmem>>, vector<9x256xf32>
    %cst_30 = arith.constant dense<0.000000e+00> : vector<8x256xf32>
    %41 = tpu.matmul %39, %40, %cst_30 {dimension_numbers = #tpu.dot_dimension_numbers<[1], [0], [0], [1], [0, 0, 1, 1], [], []>} : vector<8x9xf32>, vector<9x256xf32>, vector<8x256xf32> -> vector<8x256xf32>
    %c0_31 = arith.constant 0 : index
    %c0_32 = arith.constant 0 : index
    %42 = vector.load %arg8[%c0_31, %c0_32] : memref<8x288xf32, #tpu.memory_space<vmem>>, vector<1x256xf32>
    %43 = vector.broadcast %42 : vector<1x256xf32> to vector<8x256xf32>
    %44 = arith.addf %41, %43 : vector<8x256xf32>
    %cst_33 = arith.constant 0.000000e+00 : f32
    %45 = vector.broadcast %cst_33 : f32 to vector<8x256xf32>
    %46 = arith.cmpf ogt, %44, %45 : vector<8x256xf32>
    %cst_34 = arith.constant 0.00999999977 : f32
    %47 = vector.broadcast %cst_34 : f32 to vector<8x256xf32>
    %48 = arith.mulf %47, %44 : vector<8x256xf32>
    %49 = arith.select %46, %44, %48 : vector<8x256xi1>, vector<8x256xf32>
    %c0_35 = arith.constant 0 : index
    %c0_36 = arith.constant 0 : index
    %50 = vector.load %arg3[%c0_35, %c0_36] : memref<256x288xf32, #tpu.memory_space<vmem>>, vector<256x288xf32>
    %cst_37 = arith.constant dense<0.000000e+00> : vector<8x288xf32>
    %51 = tpu.matmul %49, %50, %cst_37 {dimension_numbers = #tpu.dot_dimension_numbers<[1], [0], [0], [1], [0, 0, 1, 1], [], []>} : vector<8x256xf32>, vector<256x288xf32>, vector<8x288xf32> -> vector<8x288xf32>
    %c1_38 = arith.constant 1 : index
    %c0_39 = arith.constant 0 : index
    %52 = vector.load %arg8[%c1_38, %c0_39] : memref<8x288xf32, #tpu.memory_space<vmem>>, vector<1x288xf32>
    %53 = vector.broadcast %52 : vector<1x288xf32> to vector<8x288xf32>
    %54 = arith.addf %51, %53 : vector<8x288xf32>
    %cst_40 = arith.constant 0.000000e+00 : f32
    %55 = vector.broadcast %cst_40 : f32 to vector<8x288xf32>
    %56 = arith.cmpf ogt, %54, %55 : vector<8x288xf32>
    %cst_41 = arith.constant 0.00999999977 : f32
    %57 = vector.broadcast %cst_41 : f32 to vector<8x288xf32>
    %58 = arith.mulf %57, %54 : vector<8x288xf32>
    %59 = arith.select %56, %54, %58 : vector<8x288xi1>, vector<8x288xf32>
    %c0_42 = arith.constant 0 : index
    %c0_43 = arith.constant 0 : index
    %60 = vector.load %arg4[%c0_42, %c0_43] : memref<288x64xf32, #tpu.memory_space<vmem>>, vector<288x64xf32>
    %cst_44 = arith.constant dense<0.000000e+00> : vector<8x64xf32>
    %61 = tpu.matmul %59, %60, %cst_44 {dimension_numbers = #tpu.dot_dimension_numbers<[1], [0], [0], [1], [0, 0, 1, 1], [], []>} : vector<8x288xf32>, vector<288x64xf32>, vector<8x64xf32> -> vector<8x64xf32>
    %c2_45 = arith.constant 2 : index
    %c0_46 = arith.constant 0 : index
    %62 = vector.load %arg8[%c2_45, %c0_46] : memref<8x288xf32, #tpu.memory_space<vmem>>, vector<1x64xf32>
    %63 = vector.broadcast %62 : vector<1x64xf32> to vector<8x64xf32>
    %64 = arith.addf %61, %63 : vector<8x64xf32>
    %cst_47 = arith.constant 0.000000e+00 : f32
    %65 = vector.broadcast %cst_47 : f32 to vector<8x64xf32>
    %66 = arith.cmpf ogt, %64, %65 : vector<8x64xf32>
    %cst_48 = arith.constant 0.00999999977 : f32
    %67 = vector.broadcast %cst_48 : f32 to vector<8x64xf32>
    %68 = arith.mulf %67, %64 : vector<8x64xf32>
    %69 = arith.select %66, %64, %68 : vector<8x64xi1>, vector<8x64xf32>
    %c1_49 = arith.constant 1 : index
    %c0_50 = arith.constant 0 : index
    %c0_51 = arith.constant 0 : index
    %70 = vector.load %arg5[%c1_49, %c0_50, %c0_51] : memref<3x64x96xf32, #tpu.memory_space<vmem>>, vector<1x64x96xf32>
    %71 = vector.shape_cast %70 : vector<1x64x96xf32> to vector<64x96xf32>
    %cst_52 = arith.constant dense<0.000000e+00> : vector<8x96xf32>
    %72 = tpu.matmul %69, %71, %cst_52 {dimension_numbers = #tpu.dot_dimension_numbers<[1], [0], [0], [1], [0, 0, 1, 1], [], []>} : vector<8x64xf32>, vector<64x96xf32>, vector<8x96xf32> -> vector<8x96xf32>
    %73 = arith.addf %37, %72 : vector<8x96xf32>
    %c2_53 = arith.constant 2 : index
    %c0_54 = arith.constant 0 : index
    %c0_55 = arith.constant 0 : index
    %74 = vector.load %arg1[%c2_53, %c0_54, %c0_55] : memref<3x8x9xf32, #tpu.memory_space<vmem>>, vector<1x8x9xf32>
    %75 = vector.shape_cast %74 : vector<1x8x9xf32> to vector<8x9xf32>
    %c0_56 = arith.constant 0 : index
    %c0_57 = arith.constant 0 : index
    %76 = vector.load %arg2[%c0_56, %c0_57] : memref<9x256xf32, #tpu.memory_space<vmem>>, vector<9x256xf32>
    %cst_58 = arith.constant dense<0.000000e+00> : vector<8x256xf32>
    %77 = tpu.matmul %75, %76, %cst_58 {dimension_numbers = #tpu.dot_dimension_numbers<[1], [0], [0], [1], [0, 0, 1, 1], [], []>} : vector<8x9xf32>, vector<9x256xf32>, vector<8x256xf32> -> vector<8x256xf32>
    %c0_59 = arith.constant 0 : index
    %c0_60 = arith.constant 0 : index
    %78 = vector.load %arg8[%c0_59, %c0_60] : memref<8x288xf32, #tpu.memory_space<vmem>>, vector<1x256xf32>
    %79 = vector.broadcast %78 : vector<1x256xf32> to vector<8x256xf32>
    %80 = arith.addf %77, %79 : vector<8x256xf32>
    %cst_61 = arith.constant 0.000000e+00 : f32
    %81 = vector.broadcast %cst_61 : f32 to vector<8x256xf32>
    %82 = arith.cmpf ogt, %80, %81 : vector<8x256xf32>
    %cst_62 = arith.constant 0.00999999977 : f32
    %83 = vector.broadcast %cst_62 : f32 to vector<8x256xf32>
    %84 = arith.mulf %83, %80 : vector<8x256xf32>
    %85 = arith.select %82, %80, %84 : vector<8x256xi1>, vector<8x256xf32>
    %c0_63 = arith.constant 0 : index
    %c0_64 = arith.constant 0 : index
    %86 = vector.load %arg3[%c0_63, %c0_64] : memref<256x288xf32, #tpu.memory_space<vmem>>, vector<256x288xf32>
    %cst_65 = arith.constant dense<0.000000e+00> : vector<8x288xf32>
    %87 = tpu.matmul %85, %86, %cst_65 {dimension_numbers = #tpu.dot_dimension_numbers<[1], [0], [0], [1], [0, 0, 1, 1], [], []>} : vector<8x256xf32>, vector<256x288xf32>, vector<8x288xf32> -> vector<8x288xf32>
    %c1_66 = arith.constant 1 : index
    %c0_67 = arith.constant 0 : index
    %88 = vector.load %arg8[%c1_66, %c0_67] : memref<8x288xf32, #tpu.memory_space<vmem>>, vector<1x288xf32>
    %89 = vector.broadcast %88 : vector<1x288xf32> to vector<8x288xf32>
    %90 = arith.addf %87, %89 : vector<8x288xf32>
    %cst_68 = arith.constant 0.000000e+00 : f32
    %91 = vector.broadcast %cst_68 : f32 to vector<8x288xf32>
    %92 = arith.cmpf ogt, %90, %91 : vector<8x288xf32>
    %cst_69 = arith.constant 0.00999999977 : f32
    %93 = vector.broadcast %cst_69 : f32 to vector<8x288xf32>
    %94 = arith.mulf %93, %90 : vector<8x288xf32>
    %95 = arith.select %92, %90, %94 : vector<8x288xi1>, vector<8x288xf32>
    %c0_70 = arith.constant 0 : index
    %c0_71 = arith.constant 0 : index
    %96 = vector.load %arg4[%c0_70, %c0_71] : memref<288x64xf32, #tpu.memory_space<vmem>>, vector<288x64xf32>
    %cst_72 = arith.constant dense<0.000000e+00> : vector<8x64xf32>
    %97 = tpu.matmul %95, %96, %cst_72 {dimension_numbers = #tpu.dot_dimension_numbers<[1], [0], [0], [1], [0, 0, 1, 1], [], []>} : vector<8x288xf32>, vector<288x64xf32>, vector<8x64xf32> -> vector<8x64xf32>
    %c2_73 = arith.constant 2 : index
    %c0_74 = arith.constant 0 : index
    %98 = vector.load %arg8[%c2_73, %c0_74] : memref<8x288xf32, #tpu.memory_space<vmem>>, vector<1x64xf32>
    %99 = vector.broadcast %98 : vector<1x64xf32> to vector<8x64xf32>
    %100 = arith.addf %97, %99 : vector<8x64xf32>
    %cst_75 = arith.constant 0.000000e+00 : f32
    %101 = vector.broadcast %cst_75 : f32 to vector<8x64xf32>
    %102 = arith.cmpf ogt, %100, %101 : vector<8x64xf32>
    %cst_76 = arith.constant 0.00999999977 : f32
    %103 = vector.broadcast %cst_76 : f32 to vector<8x64xf32>
    %104 = arith.mulf %103, %100 : vector<8x64xf32>
    %105 = arith.select %102, %100, %104 : vector<8x64xi1>, vector<8x64xf32>
    %c2_77 = arith.constant 2 : index
    %c0_78 = arith.constant 0 : index
    %c0_79 = arith.constant 0 : index
    %106 = vector.load %arg5[%c2_77, %c0_78, %c0_79] : memref<3x64x96xf32, #tpu.memory_space<vmem>>, vector<1x64x96xf32>
    %107 = vector.shape_cast %106 : vector<1x64x96xf32> to vector<64x96xf32>
    %cst_80 = arith.constant dense<0.000000e+00> : vector<8x96xf32>
    %108 = tpu.matmul %105, %107, %cst_80 {dimension_numbers = #tpu.dot_dimension_numbers<[1], [0], [0], [1], [0, 0, 1, 1], [], []>} : vector<8x64xf32>, vector<64x96xf32>, vector<8x96xf32> -> vector<8x96xf32>
    %109 = arith.addf %73, %108 : vector<8x96xf32>
    %cst_81 = arith.constant 0.000000e+00 : f32
    %110 = vector.broadcast %cst_81 : f32 to vector<8x96xf32>
    %111 = arith.cmpf ogt, %109, %110 : vector<8x96xf32>
    %cst_82 = arith.constant 0.00999999977 : f32
    %112 = vector.broadcast %cst_82 : f32 to vector<8x96xf32>
    %113 = arith.mulf %112, %109 : vector<8x96xf32>
    %114 = arith.select %111, %109, %113 : vector<8x96xi1>, vector<8x96xf32>
    %c0_83 = arith.constant 0 : index
    %c0_84 = arith.constant 0 : index
    %115 = vector.load %arg6[%c0_83, %c0_84] : memref<96x64xf32, #tpu.memory_space<vmem>>, vector<96x64xf32>
    %cst_85 = arith.constant dense<0.000000e+00> : vector<8x64xf32>
    %116 = tpu.matmul %114, %115, %cst_85 {dimension_numbers = #tpu.dot_dimension_numbers<[1], [0], [0], [1], [0, 0, 1, 1], [], []>} : vector<8x96xf32>, vector<96x64xf32>, vector<8x64xf32> -> vector<8x64xf32>
    %c4 = arith.constant 4 : index
    %c0_86 = arith.constant 0 : index
    %117 = vector.load %arg8[%c4, %c0_86] : memref<8x288xf32, #tpu.memory_space<vmem>>, vector<1x64xf32>
    %118 = vector.broadcast %117 : vector<1x64xf32> to vector<8x64xf32>
    %119 = arith.addf %116, %118 : vector<8x64xf32>
    %c0_87 = arith.constant 0 : index
    %c0_88 = arith.constant 0 : index
    %120 = vector.load %arg7[%c0_87, %c0_88] : memref<64x7xf32, #tpu.memory_space<vmem>>, vector<64x7xf32>
    %cst_89 = arith.constant dense<0.000000e+00> : vector<8x7xf32>
    %121 = tpu.matmul %119, %120, %cst_89 {dimension_numbers = #tpu.dot_dimension_numbers<[1], [0], [0], [1], [0, 0, 1, 1], [], []>} : vector<8x64xf32>, vector<64x7xf32>, vector<8x7xf32> -> vector<8x7xf32>
    %c5 = arith.constant 5 : index
    %c0_90 = arith.constant 0 : index
    %122 = vector.load %arg8[%c5, %c0_90] : memref<8x288xf32, #tpu.memory_space<vmem>>, vector<1x7xf32>
    %123 = vector.broadcast %122 : vector<1x7xf32> to vector<8x7xf32>
    %124 = arith.addf %121, %123 : vector<8x7xf32>
    %c0_91 = arith.constant 0 : index
    %c0_92 = arith.constant 0 : index
    %125 = vector.load %arg9[%c0_91, %c0_92] : memref<8x7xf32, #tpu.memory_space<vmem>>, vector<8x7xf32>
    tpu.vector_store %arg9[%c0_91, %c0_92], %124 {strides = array<i32>} : memref<8x7xf32, #tpu.memory_space<vmem>>, vector<8x7xf32>,
    return
  }
  func.func @transform_0(%arg0: i32) -> (i32, i32, i32) {
    %c0_i32 = arith.constant 0 : i32
    %c0_i32_0 = arith.constant 0 : i32
    %c0_i32_1 = arith.constant 0 : i32
    return %c0_i32, %arg0, %c0_i32_0 : i32, i32, i32
  }
  func.func @transform_1(%arg0: i32) -> (i32, i32) {
    %c0_i32 = arith.constant 0 : i32
    %c0_i32_0 = arith.constant 0 : i32
    %c0_i32_1 = arith.constant 0 : i32
    return %c0_i32, %c0_i32_0 : i32, i32
  }
  func.func @transform_2(%arg0: i32) -> (i32, i32) {
    %c0_i32 = arith.constant 0 : i32
    %c0_i32_0 = arith.constant 0 : i32
    %c0_i32_1 = arith.constant 0 : i32
    return %c0_i32, %c0_i32_0 : i32, i32
  }
  func.func @transform_3(%arg0: i32) -> (i32, i32) {
    %c0_i32 = arith.constant 0 : i32
    %c0_i32_0 = arith.constant 0 : i32
    %c0_i32_1 = arith.constant 0 : i32
    return %c0_i32, %c0_i32_0 : i32, i32
  }
  func.func @transform_4(%arg0: i32) -> (i32, i32, i32) {
    %c0_i32 = arith.constant 0 : i32
    %c0_i32_0 = arith.constant 0 : i32
    %c0_i32_1 = arith.constant 0 : i32
    %c0_i32_2 = arith.constant 0 : i32
    return %c0_i32, %c0_i32_0, %c0_i32_1 : i32, i32, i32
  }
  func.func @transform_5(%arg0: i32) -> (i32, i32) {
    %c0_i32 = arith.constant 0 : i32
    %c0_i32_0 = arith.constant 0 : i32
    %c0_i32_1 = arith.constant 0 : i32
    return %c0_i32, %c0_i32_0 : i32, i32
  }
  func.func @transform_6(%arg0: i32) -> (i32, i32) {
    %c0_i32 = arith.constant 0 : i32
    %c0_i32_0 = arith.constant 0 : i32
    %c0_i32_1 = arith.constant 0 : i32
    return %c0_i32, %c0_i32_0 : i32, i32
  }
  func.func @transform_7(%arg0: i32) -> (i32, i32) {
    %c0_i32 = arith.constant 0 : i32
    %c0_i32_0 = arith.constant 0 : i32
    %c0_i32_1 = arith.constant 0 : i32
    return %c0_i32, %c0_i32_0 : i32, i32
  }
  func.func @transform_8(%arg0: i32) -> (i32, i32) {
    %c0_i32 = arith.constant 0 : i32
    %c0_i32_0 = arith.constant 0 : i32
    return %arg0, %c0_i32 : i32, i32
  }
}

</mosaic_0001>

<bundles_post_ra>
// kernel: _cnn_forward_jit.1
= control target key start
LH: loop header
LB: loop body
LE: loop exit
PB: predicated region body
PF: predicated region fallthrough
CT: control target
= control target key end

     0   :  { %vm45_vm0 = vcmask 1040384   ;;  %vm41_vm1 = vcmask 72704   ;;  %vm369_vm7 = vcmask 261120   ;;  %vm444_vm10 = vcmask 523264   ;;  %s2608_s1 = inlined_call_operand.vmem [shape: f32[9,256], index: 1, kind: input, shape index: {}]   ;;  %s2609_s0 = inlined_call_operand.vmem [shape: f32[3,8,9], index: 0, kind: input, shape index: {}]   ;;  %s2610_s2 = inlined_call_operand.vmem [shape: f32[256,288], index: 2, kind: input, shape index: {}]   ;;  %s2611_s3 = inlined_call_operand.vmem [shape: f32[288,64], index: 3, kind: input, shape index: {}]   ;;  %s2612_s7 = inlined_call_operand.vmem [shape: f32[8,288], index: 7, kind: input, shape index: {}]   ;;  %s2613_s4 = inlined_call_operand.vmem [shape: f32[3,64,96], index: 4, kind: input, shape index: {}]   ;;  %s2614_s5 = inlined_call_operand.vmem [shape: f32[96,64], index: 5, kind: input, shape index: {}]   ;;  %s2615_s6 = inlined_call_operand.vmem [shape: f32[64,7], index: 6, kind: input, shape index: {}]   ;;  %s2616_s8 = inlined_call_operand.vmem [shape: f32[8,7], index: 8, kind: output, shape index: {}]  }
   0x1   :  { %v1230_v0 = vld [vmem:[%s2608_s1 + $0x10] sm:$0x1]  ;;  %v1235_v1 = vld [vmem:[%s2608_s1 + $0x18] sm:$0x1]  ;;  %v1240_v2 = vld [vmem:[%s2608_s1] sm:$0xff] }
   0x2   :  { %1105 = vmatpush.msk.msra.mxu0 %vm45_vm0, %v1230_v0  ;;  %1107 = vmatpush.msk.msra.mxu1 %vm45_vm0, %v1235_v1  ;;  %v1249_v3 = vld [vmem:[%s2608_s1 + $0x8] sm:$0xff]  ;;  %v30_v4 = vld [vmem:[%s2609_s0] sm:$0xff]  ;;  %v1268_v7 = vld [vmem:[%s2610_s2 + $0x150] sm:$0xff] }
   0x3   :  { %v1257_v5 = vld [vmem:[%s2610_s2 + $0x168] sm:$0xff]  ;;  %v1277_v8 = vld [vmem:[%s2610_s2 + $0x2d0] sm:$0xff]  ;;  %v1282_v9 = vld [vmem:[%s2610_s2 + $0x138] sm:$0xff] }
   0x4   :  { %203 = vmatpush.msra.mxu2 %v1257_v5  ;;  %v1263_v6 = vld [vmem:[%s2610_s2 + $0x2e8] sm:$0xff]  ;;  %67 = vmatpush.msra.mxu0 %v1240_v2  ;;  %v1289_v10 = vld [vmem:[%s2610_s2 + $0x2b8] sm:$0xff]  ;;  %v1294_v11 = vld [vmem:[%s2610_s2 + $0x120] sm:$0xff] }
   0x5   :  { %87 = vmatpush.msra.mxu1 %v1249_v3  ;;  %1106 = vmatmul.msk.f32.vlgmr.msra.gmra.mxu0 %vm41_vm1, %v30_v4  ;;  %2758 = vst [vmem:[#allocation2_spill] sm:$0xff] %v1289_v10  ;;  %v1301_v12 = vld [vmem:[%s2610_s2 + $0x2a0] sm:$0xff]  ;;  %v1306_v13 = vld [vmem:[%s2610_s2 + $0x108] sm:$0xff]  ;;  %v1313_v14 = vld [vmem:[%s2610_s2 + $0x170] sm:$0xff] }
   0x6   :  { %1108 = vmatmul.msk.f32.vlgmr.msra.gmra.mxu1 %vm41_vm1, %v30_v4  ;;  %223 = vmatpush.msra.mxu3 %v1263_v6  ;;  %2759 = vst [vmem:[#allocation3_spill] sm:$0xff] %v1301_v12  ;;  %v1318_v15 = vld [vmem:[%s2610_s2 + $0x288] sm:$0xff]  ;;  %v1323_v16 = vld [vmem:[%s2610_s2 + $0xf0] sm:$0xff]  ;;  %v1336_v18 = vld [vmem:[%s2610_s2 + $0x158] sm:$0xff] }
   0x7   :  { %204 = vmatpush.msra.mxu2 %v1268_v7  ;;  %2760 = vst [vmem:[#allocation4_spill] sm:$0xff] %v1318_v15  ;;  %243 = vmatpush.msrb.mxu0 %v1313_v14  ;;  %v1329_v17 = vld [vmem:[%s2610_s2 + $0x2f0] sm:$0xff]  ;;  %v1341_v19 = vld [vmem:[%s2610_s2 + $0x2d8] sm:$0xff]  ;;  %v1358_v22 = vld [vmem:[%s2610_s2 + $0x140] sm:$0xff] }
   0x8   :  { %224 = vmatpush.msra.mxu3 %v1277_v8  ;;  %v1346_v20 = vld [vmem:[%s2610_s2 + $0x270] sm:$0xff]  ;;  %v1351_v21 = vld [vmem:[%s2610_s2 + $0xd8] sm:$0xff]  ;;  %263 = vmatpush.msrb.mxu1 %v1329_v17  ;;  %v1365_v23 = vld [vmem:[%s2610_s2 + $0x2c0] sm:$0xff] }
   0x9   :  { %205 = vmatpush.msra.mxu2 %v1282_v9  ;;  %2761 = vst [vmem:[#allocation5_spill] sm:$0xff] %v1346_v20  ;;  %244 = vmatpush.msrb.mxu0 %v1336_v18  ;;  %v1370_v24 = vld [vmem:[%s2610_s2 + $0x128] sm:$0xff]  ;;  %v1375_v25 = vld [vmem:[%s2610_s2 + $0x258] sm:$0xff]  ;;  %v1380_v26 = vld [vmem:[%s2610_s2 + $0xc0] sm:$0xff] }
   0xa   :  { %225 = vmatpush.msra.mxu3 %v1289_v10  ;;  %2762 = vst [vmem:[#allocation6_spill] sm:$0xff] %v1375_v25  ;;  %264 = vmatpush.msrb.mxu1 %v1341_v19  ;;  %v1389_v27 = vld [vmem:[%s2610_s2 + $0x2a8] sm:$0xff]  ;;  %v1394_v28 = vld [vmem:[%s2610_s2 + $0x110] sm:$0xff]  ;;  %v1399_v29 = vld [vmem:[%s2610_s2 + $0x240] sm:$0xff] }
   0xb   :  { %206 = vmatpush.msra.mxu2 %v1294_v11  ;;  %245 = vmatpush.msrb.mxu0 %v1358_v22  ;;  %2763 = vst [vmem:[#allocation7_spill] sm:$0xff] %v1399_v29  ;;  %v1404_v30 = vld [vmem:[%s2610_s2 + $0xa8] sm:$0xff]  ;;  %v1413_v31 = vld [vmem:[%s2610_s2 + $0x290] sm:$0xff]  ;;  %v1418_v32 = vld [vmem:[%s2610_s2 + $0xf8] sm:$0xff] }
   0xc   :  { %226 = vmatpush.msra.mxu3 %v1301_v12  ;;  %265 = vmatpush.msrb.mxu1 %v1365_v23  ;;  %v1423_v33 = vld [vmem:[%s2610_s2 + $0x228] sm:$0xff]  ;;  %v1428_v34 = vld [vmem:[%s2610_s2 + $0x90] sm:$0xff]  ;;  %v1437_v35 = vld [vmem:[%s2610_s2 + $0x278] sm:$0xff] }
   0xd   :  { %207 = vmatpush.msra.mxu2 %v1306_v13  ;;  %246 = vmatpush.msrb.mxu0 %v1370_v24  ;;  %2764 = vst [vmem:[#allocation8_spill] sm:$0xff] %v1423_v33  ;;  %v1442_v36 = vld [vmem:[%s2610_s2 + $0xe0] sm:$0xff]  ;;  %v1447_v37 = vld [vmem:[%s2610_s2 + $0x210] sm:$0xff]  ;;  %v1452_v38 = vld [vmem:[%s2610_s2 + $0x78] sm:$0xff] }
   0xe   :  { %227 = vmatpush.msra.mxu3 %v1318_v15  ;;  %266 = vmatpush.msrb.mxu1 %v1389_v27  ;;  %2765 = vst [vmem:[#allocation9_spill] sm:$0xff] %v1437_v35  ;;  %v1461_v39 = vld [vmem:[%s2610_s2 + $0x260] sm:$0xff]  ;;  %v1466_v40 = vld [vmem:[%s2610_s2 + $0xc8] sm:$0xff]  ;;  %v1471_v41 = vld [vmem:[%s2610_s2 + $0x1f8] sm:$0xff] }
   0xf   :  { %208 = vmatpush.msra.mxu2 %v1323_v16  ;;  %247 = vmatpush.msrb.mxu0 %v1394_v28  ;;  %2766 = vst [vmem:[#allocation10_spill] sm:$0xff] %v1447_v37  ;;  %v1476_v42 = vld [vmem:[%s2610_s2 + $0x60] sm:$0xff]  ;;  %v1485_v43 = vld [vmem:[%s2610_s2 + $0x248] sm:$0xff]  ;;  %v1490_v44 = vld [vmem:[%s2610_s2 + $0xb0] sm:$0xff] }
  0x10   :  { %228 = vmatpush.msra.mxu3 %v1346_v20  ;;  %267 = vmatpush.msrb.mxu1 %v1413_v31  ;;  %2767 = vst [vmem:[#allocation11_spill] sm:$0xff] %v1461_v39  ;;  %v1495_v45 = vld [vmem:[%s2610_s2 + $0x1e0] sm:$0xff]  ;;  %v1500_v46 = vld [vmem:[%s2610_s2 + $0x48] sm:$0xff]  ;;  %v1509_v47 = vld [vmem:[%s2610_s2 + $0x230] sm:$0xff] }
  0x11   :  { %209 = vmatpush.msra.mxu2 %v1351_v21  ;;  %248 = vmatpush.msrb.mxu0 %v1418_v32  ;;  %2768 = vst [vmem:[#allocation12_spill] sm:$0xff] %v1466_v40  ;;  %v1514_v48 = vld [vmem:[%s2610_s2 + $0x98] sm:$0xff]  ;;  %v1519_v49 = vld [vmem:[%s2610_s2 + $0x1c8] sm:$0xff]  ;;  %v1524_v50 = vld [vmem:[%s2610_s2 + $0x30] sm:$0xff] }
  0x12   :  { %229 = vmatpush.msra.mxu3 %v1375_v25  ;;  %2769 = vst [vmem:[#allocation13_spill] sm:$0xff] %v1471_v41  ;;  %268 = vmatpush.msrb.mxu1 %v1437_v35  ;;  %v1533_v51 = vld [vmem:[%s2610_s2 + $0x218] sm:$0xff]  ;;  %v1538_v52 = vld [vmem:[%s2610_s2 + $0x80] sm:$0xff]  ;;  %v1543_v53 = vld [vmem:[%s2610_s2 + $0x1b0] sm:$0xff] }
  0x13   :  { %210 = vmatpush.msra.mxu2 %v1380_v26  ;;  %2770 = vst [vmem:[#allocation14_spill] sm:$0xff] %v1476_v42  ;;  %249 = vmatpush.msrb.mxu0 %v1442_v36  ;;  %v1548_v54 = vld [vmem:[%s2610_s2 + $0x18] sm:$0xff]  ;;  %v1557_v55 = vld [vmem:[%s2610_s2 + $0x200] sm:$0xff]  ;;  %v1562_v56 = vld [vmem:[%s2610_s2 + $0x68] sm:$0xff] }
  0x14   :  { %230 = vmatpush.msra.mxu3 %v1399_v29  ;;  %2771 = vst [vmem:[#allocation15_spill] sm:$0xff] %v1485_v43  ;;  %269 = vmatpush.msrb.mxu1 %v1461_v39  ;;  %v1567_v57 = vld [vmem:[%s2610_s2 + $0x198] sm:$0xff]  ;;  %v1572_v58 = vld [vmem:[%s2610_s2] sm:$0xff]  ;;  %v1586_v60 = vld [vmem:[%s2610_s2 + $0x1e8] sm:$0xff] }
  0x15   :  { %211 = vmatpush.msra.mxu2 %v1404_v30  ;;  %2772 = vst [vmem:[#allocation16_spill] sm:$0xff] %v1490_v44  ;;  %250 = vmatpush.msrb.mxu0 %v1466_v40  ;;  %v1581_v59 = vld [vmem:[%s2610_s2 + $0x178] sm:$0xff]  ;;  %v1591_v61 = vld [vmem:[%s2610_s2 + $0x180] sm:$0xff]  ;;  %v1598_v62 = vld [vmem:[%s2610_s2 + $0x50] sm:$0xff] }
  0x16   :  { %231 = vmatpush.msra.mxu3 %v1423_v33  ;;  %2773 = vst [vmem:[#allocation17_spill] sm:$0xff] %v1495_v45  ;;  %270 = vmatpush.msrb.mxu1 %v1485_v43  ;;  %v1605_v63 = vld [vmem:[%s2610_s2 + $0x2f8] sm:$0xff]  ;;  %v1610_v4 = vld [vmem:[%s2610_s2 + $0x160] sm:$0xff]  ;;  %v1690_v33 = vld [vmem:[%s2610_s2 + $0xd0] sm:$0xff] }
  0x17   :  { %212 = vmatpush.msra.mxu2 %v1428_v34  ;;  %2774 = vst [vmem:[#allocation18_spill] sm:$0xff] %v1500_v46  ;;  %251 = vmatpush.msrb.mxu0 %v1490_v44  ;;  %v1727_v29 = vld [vmem:[%s2610_s2 + $0xa0] sm:$0xff]  ;;  %v1794_v25 = vld [vmem:[%s2610_s2 + $0x1d8] sm:$0xff]  ;;  %v1842_v20 = vld [vmem:[%s2611_s3 + $0xf0] sm:$0xff] }
  0x18   :  { %232 = vmatpush.msra.mxu3 %v1447_v37  ;;  %2775 = vst [vmem:[#allocation19_spill] sm:$0xff] %v1509_v47  ;;  %271 = vmatpush.msrb.mxu1 %v1509_v47  ;;  %v1666_v37 = vld [vmem:[%s2610_s2 + $0x100] sm:$0xff]  ;;  %v1858_v47 = vld [vmem:[%s2611_s3 + $0xe8] sm:$0xff] }
  0x19   :  { %213 = vmatpush.msra.mxu2 %v1452_v38  ;;  %2776 = vst [vmem:[#allocation20_spill] sm:$0xff] %v1514_v48  ;;  %252 = vmatpush.msrb.mxu0 %v1514_v48  ;;  %v1870_v48 = vld [vmem:[%s2611_s3 + $0xe0] sm:$0xff] }
  0x1a   :  { %233 = vmatpush.msra.mxu3 %v1471_v41  ;;  %2777 = vst [vmem:[#allocation21_spill] sm:$0xff] %v1519_v49  ;;  %272 = vmatpush.msrb.mxu1 %v1533_v51  ;;  %v1654_v41 = vld [vmem:[%s2610_s2 + $0x118] sm:$0xff]  ;;  %v1921_v15 = vld [vmem:[%s2611_s3 + $0xc0] sm:$0xff] }
  0x1b   :  { %214 = vmatpush.msra.mxu2 %v1476_v42  ;;  %2778 = vst [vmem:[#allocation22_spill] sm:$0xff] %v1524_v50  ;;  %253 = vmatpush.msrb.mxu0 %v1538_v52 }
  0x1c   :  { %234 = vmatpush.msra.mxu3 %v1495_v45  ;;  %2779 = vst [vmem:[#allocation23_spill] sm:$0xff] %v1533_v51  ;;  %273 = vmatpush.msrb.mxu1 %v1557_v55  ;;  %v1641_v45 = vld [vmem:[%s2610_s2 + $0x130] sm:$0xff]  ;;  %v1816_v51 = vld [vmem:[%s2610_s2 + $0x1a8] sm:$0xff] }
  0x1d   :  { %215 = vmatpush.msra.mxu2 %v1500_v46  ;;  %2780 = vst [vmem:[#allocation24_spill] sm:$0xff] %v1538_v52  ;;  %254 = vmatpush.msrb.mxu0 %v1562_v56  ;;  %v1828_v52 = vld [vmem:[%s2610_s2 + $0x190] sm:$0xff] }
  0x1e   :  { %2781 = vst [vmem:[#allocation25_spill] sm:$0xff] %v1543_v53  ;;  %235 = vmatpush.msra.mxu3 %v1519_v49  ;;  %274 = vmatpush.msrb.mxu1 %v1586_v60  ;;  %v1628_v49 = vld [vmem:[%s2610_s2 + $0x148] sm:$0xff] }
  0x1f   :  { %2782 = vst [vmem:[#allocation26_spill] sm:$0xff] %v1548_v54  ;;  %216 = vmatpush.msra.mxu2 %v1524_v50  ;;  %255 = vmatpush.msrb.mxu0 %v1598_v62 }
  0x20   :  { %2783 = vst [vmem:[#allocation27_spill] sm:$0xff] %v1557_v55  ;;  %236 = vmatpush.msra.mxu3 %v1543_v53  ;;  %v1623_v53 = vld [vmem:[%s2610_s2 + $0x2e0] sm:$0xff]  ;;  %v1763_v55 = vld [vmem:[%s2610_s2 + $0x8] sm:$0xff] }
  0x21   :  { %2784 = vst [vmem:[#allocation28_spill] sm:$0xff] %v1562_v56  ;;  %217 = vmatpush.msra.mxu2 %v1548_v54  ;;  %v1768_v56 = vld [vmem:[%s2610_s2 + $0x188] sm:$0xff] }
  0x22   :  { %2785 = vst [vmem:[#allocation29_spill] sm:$0xff] %v1567_v57  ;;  %237 = vmatpush.msra.mxu3 %v1567_v57  ;;  %v1617_v57 = vld [vmem:[%s2610_s2 + $0x1d0] sm:$0xff] }
  0x23   :  { %2786 = vst [vmem:[#allocation30_spill] sm:$0xff] %v1572_v58  ;;  %218 = vmatpush.msra.mxu2 %v1572_v58  ;;  %275 = vmatpush.msrb.mxu1 %v1617_v57 }
  0x24   :  { %2787 = vst [vmem:[#allocation31_spill] sm:$0xff] %v1581_v59  ;;  %238 = vmatpush.msra.mxu3 %v1591_v61 }
  0x25   :  { %2788 = vst [vmem:[#allocation32_spill] sm:$0xff] %v1586_v60  ;;  %283 = vmatpush.msrb.mxu2 %v1581_v59  ;;  %v1702_v60 = vld [vmem:[%s2610_s2 + $0xb8] sm:$0xff] }
  0x26   :  { %2789 = vst [vmem:[#allocation33_spill] sm:$0xff] %v1591_v61  ;;  %303 = vmatpush.msrb.mxu3 %v1605_v63  ;;  %v1636_v61 = vld [vmem:[%s2610_s2 + $0x2c8] sm:$0xff] }
  0x27   :  { %2790 = vst [vmem:[#allocation34_spill] sm:$0xff] %v1598_v62  ;;  %284 = vmatpush.msrb.mxu2 %v1610_v4  ;;  %v1717_v62 = vld [vmem:[%s2610_s2 + $0x38] sm:$0xff] }
  0x28   :  { %2791 = vst [vmem:[#allocation35_spill] sm:$0xff] %v1605_v63  ;;  %304 = vmatpush.msrb.mxu3 %v1623_v53  ;;  %v1649_v63 = vld [vmem:[%s2610_s2 + $0x2b0] sm:$0xff]  ;;  %256 = vmatpush.msrb.mxu0 %v1717_v62 }
  0x29   :  { %2792 = vst [vmem:[#allocation36_spill] sm:$0xff] %v1610_v4  ;;  %285 = vmatpush.msrb.mxu2 %v1628_v49 }
  0x2a   :  { %2793 = vst [vmem:[#allocation37_spill] sm:$0xff] %v1617_v57  ;;  %305 = vmatpush.msrb.mxu3 %v1636_v61  ;;  %v1678_v57 = vld [vmem:[%s2610_s2 + $0xe8] sm:$0xff] }
  0x2b   :  { %2794 = vst [vmem:[#allocation38_spill] sm:$0xff] %v1623_v53  ;;  %286 = vmatpush.msrb.mxu2 %v1641_v45  ;;  %v1661_v53 = vld [vmem:[%s2610_s2 + $0x298] sm:$0xff] }
  0x2c   :  { %2795 = vst [vmem:[#allocation39_spill] sm:$0xff] %v1628_v49  ;;  %306 = vmatpush.msrb.mxu3 %v1649_v63 }
  0x2d   :  { %2796 = vst [vmem:[#allocation40_spill] sm:$0xff] %v1636_v61  ;;  %287 = vmatpush.msrb.mxu2 %v1654_v41  ;;  %v1673_v61 = vld [vmem:[%s2610_s2 + $0x280] sm:$0xff] }
  0x2e   :  { %2797 = vst [vmem:[#allocation41_spill] sm:$0xff] %v1641_v45  ;;  %307 = vmatpush.msrb.mxu3 %v1661_v53 }
  0x2f   :  { %2798 = vst [vmem:[#allocation42_spill] sm:$0xff] %v1649_v63  ;;  %288 = vmatpush.msrb.mxu2 %v1666_v37  ;;  %v1685_v63 = vld [vmem:[%s2610_s2 + $0x268] sm:$0xff] }
  0x30   :  { %2799 = vst [vmem:[#allocation43_spill] sm:$0xff] %v1654_v41  ;;  %308 = vmatpush.msrb.mxu3 %v1673_v61 }
  0x31   :  { %2800 = vst [vmem:[#allocation44_spill] sm:$0xff] %v1661_v53  ;;  %289 = vmatpush.msrb.mxu2 %v1678_v57  ;;  %v1697_v53 = vld [vmem:[%s2610_s2 + $0x250] sm:$0xff] }
  0x32   :  { %2801 = vst [vmem:[#allocation45_spill] sm:$0xff] %v1666_v37  ;;  %309 = vmatpush.msrb.mxu3 %v1685_v63 }
  0x33   :  { %2802 = vst [vmem:[#allocation46_spill] sm:$0xff] %v1673_v61  ;;  %290 = vmatpush.msrb.mxu2 %v1690_v33  ;;  %v1709_v61 = vld [vmem:[%s2610_s2 + $0x238] sm:$0xff] }
  0x34   :  { %2803 = vst [vmem:[#allocation47_spill] sm:$0xff] %v1678_v57  ;;  %310 = vmatpush.msrb.mxu3 %v1697_v53 }
  0x35   :  { %2804 = vst [vmem:[#allocation48_spill] sm:$0xff] %v1685_v63  ;;  %291 = vmatpush.msrb.mxu2 %v1702_v60  ;;  %v1722_v63 = vld [vmem:[%s2610_s2 + $0x1b8] sm:$0xff] }
  0x36   :  { %2805 = vst [vmem:[#allocation49_spill] sm:$0xff] %v1690_v33  ;;  %311 = vmatpush.msrb.mxu3 %v1709_v61  ;;  %276 = vmatpush.msrb.mxu1 %v1722_v63 }
  0x37   :  { %2806 = vst [vmem:[#allocation50_spill] sm:$0xff] %v1697_v53  ;;  %292 = vmatpush.msrb.mxu2 %v1727_v29  ;;  %v1741_v53 = vld [vmem:[%s2610_s2 + $0x20] sm:$0xff] }
  0x38   :  { %2807 = vst [vmem:[#allocation51_spill] sm:$0xff] %v1702_v60  ;;  %257 = vmatpush.msrb.mxu0 %v1741_v53 }
  0x39   :  { %2808 = vst [vmem:[#allocation52_spill] sm:$0xff] %v1709_v61  ;;  %v1734_v61 = vld [vmem:[%s2610_s2 + $0x220] sm:$0xff] }
  0x3a   :  { %2809 = vst [vmem:[#allocation53_spill] sm:$0xff] %v1717_v62  ;;  %312 = vmatpush.msrb.mxu3 %v1734_v61  ;;  %v1746_v62 = vld [vmem:[%s2610_s2 + $0x1a0] sm:$0xff]  ;;  %258 = vmatpush.msrb.mxu0 %v1763_v55 }
  0x3b   :  { %2810 = vst [vmem:[#allocation54_spill] sm:$0xff] %v1722_v63  ;;  %v1751_v63 = vld [vmem:[%s2610_s2 + $0x88] sm:$0xff]  ;;  %277 = vmatpush.msrb.mxu1 %v1746_v62 }
  0x3c   :  { %2811 = vst [vmem:[#allocation55_spill] sm:$0xff] %v1727_v29  ;;  %293 = vmatpush.msrb.mxu2 %v1751_v63 }
  0x3d   :  { %2812 = vst [vmem:[#allocation56_spill] sm:$0xff] %v1734_v61  ;;  %v1758_v61 = vld [vmem:[%s2610_s2 + $0x208] sm:$0xff]  ;;  %278 = vmatpush.msrb.mxu1 %v1768_v56 }
  0x3e   :  { %2813 = vst [vmem:[#allocation57_spill] sm:$0xff] %v1741_v53  ;;  %313 = vmatpush.msrb.mxu3 %v1758_v61  ;;  %v1780_v53 = vld [vmem:[%s2610_s2 + $0x1f0] sm:$0xff] }
  0x3f   :  { %2814 = vst [vmem:[#allocation58_spill] sm:$0xff] %v1746_v62  ;;  %v1775_v62 = vld [vmem:[%s2610_s2 + $0x70] sm:$0xff] }
  0x40   :  { %2815 = vst [vmem:[#allocation59_spill] sm:$0xff] %v1751_v63  ;;  %294 = vmatpush.msrb.mxu2 %v1775_v62  ;;  %314 = vmatpush.msrb.mxu3 %v1780_v53 }
  0x41   :  { %2816 = vst [vmem:[#allocation60_spill] sm:$0xff] %v1758_v61  ;;  %v1789_v61 = vld [vmem:[%s2610_s2 + $0x58] sm:$0xff] }
  0x42   :  { %2817 = vst [vmem:[#allocation61_spill] sm:$0xff] %v1763_v55  ;;  %v1799_v55 = vld [vmem:[%s2610_s2 + $0x40] sm:$0xff]  ;;  %295 = vmatpush.msrb.mxu2 %v1789_v61  ;;  %315 = vmatpush.msrb.mxu3 %v1794_v25 }
  0x43   :  { %2818 = vst [vmem:[#allocation62_spill] sm:$0xff] %v1768_v56  ;;  %v1811_v56 = vld [vmem:[%s2610_s2 + $0x28] sm:$0xff] }
  0x44   :  { %2819 = vst [vmem:[#allocation63_spill] sm:$0xff] %v1775_v62  ;;  %296 = vmatpush.msrb.mxu2 %v1799_v55 }
  0x45   :  { %2820 = vst [vmem:[#allocation64_spill] sm:$0xff] %v1780_v53  ;;  %v1806_v53 = vld [vmem:[%s2610_s2 + $0x1c0] sm:$0xff] }
  0x46   :  { %2821 = vst [vmem:[#allocation65_spill] sm:$0xff] %v1789_v61  ;;  %316 = vmatpush.msrb.mxu3 %v1806_v53  ;;  %297 = vmatpush.msrb.mxu2 %v1811_v56 }
  0x47   :  { %2822 = vst [vmem:[#allocation66_spill] sm:$0xff] %v1794_v25  ;;  %v1823_v25 = vld [vmem:[%s2610_s2 + $0x10] sm:$0xff] }
  0x48   :  { %2823 = vst [vmem:[#allocation67_spill] sm:$0xff] %v1799_v55  ;;  %317 = vmatpush.msrb.mxu3 %v1816_v51  ;;  %298 = vmatpush.msrb.mxu2 %v1823_v25 }
  0x49   :  { %2824 = vst [vmem:[#allocation68_spill] sm:$0xff] %v1806_v53  ;;  %v1837_v53 = vld [vmem:[%s2611_s3 + $0xf8] sm:$0xff] }
  0x4a   :  { %2825 = vst [vmem:[#allocation69_spill] sm:$0xff] %v1811_v56  ;;  %318 = vmatpush.msrb.mxu3 %v1828_v52  ;;  %393 = vmatpush.msra.mxu1 %v1837_v53 }
  0x4b   :  { %2826 = vst [vmem:[#allocation70_spill] sm:$0xff] %v1816_v51  ;;  %v1848_v51 = vld [vmem:[%s2611_s3 + $0x78] sm:$0xff] }
  0x4c   :  { %2827 = vst [vmem:[#allocation71_spill] sm:$0xff] %v1823_v25  ;;  %373 = vmatpush.msra.mxu0 %v1848_v51  ;;  %394 = vmatpush.msra.mxu1 %v1842_v20 }
  0x4d   :  { %2828 = vst [vmem:[#allocation72_spill] sm:$0xff] %v1828_v52  ;;  %v1853_v52 = vld [vmem:[%s2611_s3 + $0x70] sm:$0xff] }
  0x4e   :  { %2829 = vst [vmem:[#allocation73_spill] sm:$0xff] %v1837_v53  ;;  %v1865_v53 = vld [vmem:[%s2611_s3 + $0x68] sm:$0xff]  ;;  %374 = vmatpush.msra.mxu0 %v1853_v52  ;;  %395 = vmatpush.msra.mxu1 %v1858_v47 }
  0x4f   :  { %2830 = vst [vmem:[#allocation74_spill] sm:$0xff] %v1842_v20  ;;  %v1882_v20 = vld [vmem:[%s2611_s3 + $0xd8] sm:$0xff] }
  0x50   :  { %2831 = vst [vmem:[#allocation75_spill] sm:$0xff] %v1848_v51  ;;  %v1877_v51 = vld [vmem:[%s2611_s3 + $0x60] sm:$0xff]  ;;  %375 = vmatpush.msra.mxu0 %v1865_v53  ;;  %396 = vmatpush.msra.mxu1 %v1870_v48 }
  0x51   :  { %2832 = vst [vmem:[#allocation76_spill] sm:$0xff] %v1853_v52  ;;  %v1889_v52 = vld [vmem:[%s2611_s3 + $0x58] sm:$0xff] }
  0x52   :  { %2833 = vst [vmem:[#allocation77_spill] sm:$0xff] %v1858_v47  ;;  %v1894_v47 = vld [vmem:[%s2611_s3 + $0xd0] sm:$0xff]  ;;  %376 = vmatpush.msra.mxu0 %v1877_v51  ;;  %397 = vmatpush.msra.mxu1 %v1882_v20 }
  0x53   :  { %2834 = vst [vmem:[#allocation78_spill] sm:$0xff] %v1865_v53  ;;  %v1901_v53 = vld [vmem:[%s2611_s3 + $0x50] sm:$0xff] }
  0x54   :  { %2835 = vst [vmem:[#allocation79_spill] sm:$0xff] %v1870_v48  ;;  %v1906_v48 = vld [vmem:[%s2611_s3 + $0xc8] sm:$0xff]  ;;  %377 = vmatpush.msra.mxu0 %v1889_v52  ;;  %398 = vmatpush.msra.mxu1 %v1894_v47 }
  0x55   :  { %2836 = vst [vmem:[#allocation80_spill] sm:$0xff] %v1877_v51  ;;  %v1913_v51 = vld [vmem:[%s2611_s3 + $0x48] sm:$0xff] }
  0x56   :  { %2837 = vst [vmem:[#allocation81_spill] sm:$0xff] %v1882_v20  ;;  %v35_v20 = vld [vmem:[%s2612_s7] ss:$8 sm:$0x3]  ;;  %378 = vmatpush.msra.mxu0 %v1901_v53  ;;  %399 = vmatpush.msra.mxu1 %v1906_v48 }
  0x57   :  { %2838 = vst [vmem:[#allocation82_spill] sm:$0xff] %v1889_v52  ;;  %v1933_v52 = vld [vmem:[%s2611_s3 + $0xb8] sm:$0xff]  ;;  %v1936_v43 = vperm.slane %v35_v20, 0  ;;  %v1938_v44 = vperm.slane %v35_v20, 1  ;;  %v1956_v20 = vld [vmem:[%s2611_s3 + $0xa8] sm:$0xff] }
  0x58   :  { %2839 = vst [vmem:[#allocation83_spill] sm:$0xff] %v1894_v47  ;;  %v1928_v47 = vld [vmem:[%s2611_s3 + $0x40] sm:$0xff]  ;;  %379 = vmatpush.msra.mxu0 %v1913_v51  ;;  %400 = vmatpush.msra.mxu1 %v1921_v15 }
  0x59   :  { %2840 = vst [vmem:[#allocation84_spill] sm:$0xff] %v1901_v53  ;;  %v1949_v53 = vld [vmem:[%s2611_s3 + $0xb0] sm:$0xff] }
  0x5a   :  { %2841 = vst [vmem:[#allocation85_spill] sm:$0xff] %v1906_v48  ;;  %v1944_v48 = vld [vmem:[%s2611_s3 + $0x38] sm:$0xff]  ;;  %380 = vmatpush.msra.mxu0 %v1928_v47  ;;  %401 = vmatpush.msra.mxu1 %v1933_v52 }
  0x5b   :  { %2842 = vst [vmem:[#allocation86_spill] sm:$0xff] %v1913_v51 }
  0x5c   :  { %2843 = vst [vmem:[#allocation87_spill] sm:$0xff] %v1921_v15  ;;  %381 = vmatpush.msra.mxu0 %v1944_v48  ;;  %402 = vmatpush.msra.mxu1 %v1949_v53 }
  0x5d   :  { %2844 = vst [vmem:[#allocation88_spill] sm:$0xff] %v1928_v47  ;;  %v1965_v47 = vld [vmem:[%s2611_s3 + $0xa0] sm:$0xff] }
  0x5e   :  { %2845 = vst [vmem:[#allocation89_spill] sm:$0xff] %v1933_v52  ;;  %403 = vmatpush.msra.mxu1 %v1956_v20 }
  0x5f   :  { %2846 = vst [vmem:[#allocation90_spill] sm:$0xff] %v1944_v48 }
  0x60   :  { %404 = vmatpush.msra.mxu1 %v1965_v47 }
  0x82   :  { %v69_v51 = vpop.f32.mrf.mxu0 }
  0x83   :  { %v89_v12 = vpop.f32.mrf.mxu1  ;;  %v70_v15 = vadd.f32 %v69_v51, %v1936_v43  ;;  %v2040_v51 = vld [vmem:[%s2611_s3 + $0x18] sm:$0xff] }
  0x84   :  { %v90_v39 = vadd.f32 %v89_v12, %v1938_v44  ;;  %v2009_v12 = vld [vmem:[%s2611_s3 + $0x98] sm:$0xff]  ;;  %2850 = vst [vmem:[#allocation94_spill] sm:$0xff] %v2040_v51 }
  0x85   :  { %v94_v52 = vmul.f32 0.01, %v70_v15  ;;  %vm92_vm2 = vcmp.gt.f32.partialorder %v70_v15, 0.0  ;;  %405 = vmatpush.msra.mxu1 %v2009_v12 }
  0x86   :  { %v95_v40 = vmul.f32 0.01, %v90_v39  ;;  %vm93_vm3 = vcmp.gt.f32.partialorder %v90_v39, 0.0 }
  0x87   :  { %v96_v10 = vsel %vm92_vm2, %v70_v15, %v94_v52  ;;  %v2016_v15 = vld [vmem:[%s2611_s3 + $0x28] sm:$0xff]  ;;  %v2045_v52 = vld [vmem:[%s2611_s3 + $0x80] sm:$0xff] }
  0x88   :  { %v97_v35 = vsel %vm93_vm3, %v90_v39, %v95_v40  ;;  %219 = vmatmul.f32.vlgmr.msra.gmra.mxu2 %v96_v10  ;;  %259 = vmatmul.f32.vlgmr.msrb.gmra.mxu0 %v96_v10  ;;  %2848 = vst [vmem:[#allocation92_spill] sm:$0xff] %v2016_v15  ;;  %v2028_v39 = vld [vmem:[%s2611_s3 + $0x20] sm:$0xff]  ;;  %v2033_v40 = vld [vmem:[%s2611_s3 + $0x88] sm:$0xff] }
  0x89   :  { %239 = vmatmul.f32.vlgmr.msra.gmra.mxu3 %v97_v35  ;;  %279 = vmatmul.f32.vlgmr.msrb.gmra.mxu1 %v97_v35  ;;  %2849 = vst [vmem:[#allocation93_spill] sm:$0xff] %v2028_v39 }
  0x8a   :  { %520 = vmatpush.msra.mxu2 %v1257_v5 }
  0x8c   :  { %521 = vmatpush.msra.mxu2 %v1268_v7 }
  0x8e   :  { %522 = vmatpush.msra.mxu2 %v1282_v9 }
  0x90   :  { %299 = vmatmul.f32.vlgmr.msrb.gmra.mxu2 %v96_v10  ;;  %v2004_v10 = vld [vmem:[%s2611_s3 + $0x30] sm:$0xff] }
  0x91   :  { %319 = vmatmul.f32.vlgmr.msrb.gmra.mxu3 %v97_v35  ;;  %523 = vmatpush.msra.mxu2 %v1294_v11  ;;  %2847 = vst [vmem:[#allocation91_spill] sm:$0xff] %v2004_v10  ;;  %v2021_v35 = vld [vmem:[%s2611_s3 + $0x90] sm:$0xff] }
  0x92   :  { %382 = vmatpush.msra.mxu0 %v2004_v10  ;;  %406 = vmatpush.msra.mxu1 %v2021_v35 }
  0x93   :  { %524 = vmatpush.msra.mxu2 %v1306_v13 }
  0x94   :  { %383 = vmatpush.msra.mxu0 %v2016_v15  ;;  %407 = vmatpush.msra.mxu1 %v2033_v40 }
  0x95   :  { %525 = vmatpush.msra.mxu2 %v1323_v16 }
  0x96   :  { %384 = vmatpush.msra.mxu0 %v2028_v39  ;;  %408 = vmatpush.msra.mxu1 %v2045_v52 }
  0x97   :  { %526 = vmatpush.msra.mxu2 %v1351_v21 }
  0x98   :  { %385 = vmatpush.msra.mxu0 %v2040_v51  ;;  %1115 = vmatpush.msk.msrb.mxu1 %vm45_vm0, %v1235_v1 }
  0x99   :  { %527 = vmatpush.msra.mxu2 %v1380_v26 }
  0x9a   :  { %509 = vmatpush.msrb.mxu1 %v1249_v3 }
  0x9b   :  { %528 = vmatpush.msra.mxu2 %v1404_v30 }
  0x9d   :  { %529 = vmatpush.msra.mxu2 %v1428_v34 }
  0x9f   :  { %530 = vmatpush.msra.mxu2 %v1452_v38 }
  0xa1   :  { %531 = vmatpush.msra.mxu2 %v1476_v42 }
  0xa3   :  { %532 = vmatpush.msra.mxu2 %v1500_v46 }
  0xa5   :  { %533 = vmatpush.msra.mxu2 %v1524_v50 }
  0xa7   :  { %534 = vmatpush.msra.mxu2 %v1548_v54 }
  0xa9   :  { %535 = vmatpush.msra.mxu2 %v1572_v58 }
  0xab   :  { %600 = vmatpush.msrb.mxu2 %v1581_v59  ;;  %v441_v59 = vld [vmem:[%s2613_s4 + $0x28] sm:$0xff] }
  0xad   :  { %601 = vmatpush.msrb.mxu2 %v1610_v4 }
  0xaf   :  { %602 = vmatpush.msrb.mxu2 %v1628_v49 }
  0xb1   :  { %603 = vmatpush.msrb.mxu2 %v1641_v45 }
  0xb3   :  { %604 = vmatpush.msrb.mxu2 %v1654_v41  ;;  %v442_v41 = vld [vmem:[%s2613_s4 + $0x30] sm:$0xff] }
  0xb5   :  { %605 = vmatpush.msrb.mxu2 %v1666_v37 }
  0xb7   :  { %606 = vmatpush.msrb.mxu2 %v1678_v57  ;;  %v443_v57 = vld [vmem:[%s2613_s4 + $0x38] sm:$0xff] }
  0xb8   :  { %456 = vmatpush.msra.mxu3 %v443_v57  ;;  %v440_v57 = vld [vmem:[%s2613_s4 + $0x20] sm:$0xff] }
  0xb9   :  { %607 = vmatpush.msrb.mxu2 %v1690_v33 }
  0xba   :  { %457 = vmatpush.msra.mxu3 %v442_v41  ;;  %v439_v41 = vld [vmem:[%s2613_s4 + $0x18] sm:$0xff] }
  0xbb   :  { %608 = vmatpush.msrb.mxu2 %v1702_v60  ;;  %v1109_v60 = vld [vmem:[%s2612_s7 + $0x1] ss:$8 sm:$0x7] }
  0xbc   :  { %v2097_v33 = vperm.slane %v1109_v60, 1  ;;  %v2106_v4 = vperm.slane %v1109_v60, 0  ;;  %458 = vmatpush.msra.mxu3 %v441_v59  ;;  %v2122_v59 = vperm.slane %v1109_v60, 2 }
  0xbd   :  { %609 = vmatpush.msrb.mxu2 %v1727_v29  ;;  %v2091_v29 = vld [vmem:[%s2611_s3 + $0x100] sm:$0xff] }
  0xbe   :  { %2854 = vst [vmem:[#allocation98_spill] sm:$0xff] %v2097_v33  ;;  %459 = vmatpush.msra.mxu3 %v440_v57  ;;  %v2866_v57 = vld [vmem:[#allocation24_spill] sm:$0xff] }
  0xbf   :  { %610 = vmatpush.msrb.mxu2 %v1751_v63  ;;  %v2085_v63 = vld [vmem:[%s2611_s3 + $0x108] sm:$0xff] }
  0xc0   :  { %460 = vmatpush.msra.mxu3 %v439_v41  ;;  %v2868_v41 = vld [vmem:[#allocation6_spill] sm:$0xff] }
  0xc1   :  { %611 = vmatpush.msrb.mxu2 %v1775_v62  ;;  %v2079_v62 = vld [vmem:[%s2611_s3 + $0x110] sm:$0xff] }
  0xc3   :  { %612 = vmatpush.msrb.mxu2 %v1789_v61  ;;  %v2073_v61 = vld [vmem:[%s2611_s3 + $0x118] sm:$0xff] }
  0xc5   :  { %613 = vmatpush.msrb.mxu2 %v1799_v55  ;;  %v2065_v55 = vld [vmem:[%s2611_s3] sm:$0xff] }
  0xc6   :  { %2853 = vst [vmem:[#allocation97_spill] sm:$0xff] %v2065_v55 }
  0xc7   :  { %614 = vmatpush.msrb.mxu2 %v1811_v56  ;;  %v2060_v56 = vld [vmem:[%s2611_s3 + $0x8] sm:$0xff] }
  0xc8   :  { %2852 = vst [vmem:[#allocation96_spill] sm:$0xff] %v2060_v56 }
  0xc9   :  { %615 = vmatpush.msrb.mxu2 %v1823_v25  ;;  %v2052_v25 = vld [vmem:[%s2611_s3 + $0x10] sm:$0xff] }
  0xca   :  { %2851 = vst [vmem:[#allocation95_spill] sm:$0xff] %v2052_v25  ;;  %386 = vmatpush.msra.mxu0 %v2052_v25 }
  0xcc   :  { %387 = vmatpush.msra.mxu0 %v2060_v56 }
  0xce   :  { %388 = vmatpush.msra.mxu0 %v2065_v55 }
  0xd0   :  { %425 = vmatpush.msrb.mxu0 %v2073_v61 }
  0xd2   :  { %426 = vmatpush.msrb.mxu0 %v2079_v62 }
  0xd4   :  { %427 = vmatpush.msrb.mxu0 %v2085_v63 }
  0xd6   :  { %428 = vmatpush.msrb.mxu0 %v2091_v29 }
 0x105   :  { %v260_v37 = vpop.f32.mrf.mxu0 }
 0x106   :  { %v261_v45 = vadd.f32 %v260_v37, %v2097_v33  ;;  %v280_v49 = vpop.f32.mrf.mxu1 }
 0x108   :  { %v281_v58 = vadd.f32 %v280_v49, %v261_v45  ;;  %v438_v45 = vld [vmem:[%s2613_s4 + $0x10] sm:$0xff] }
 0x109   :  { %461 = vmatpush.msra.mxu3 %v438_v45  ;;  %v2869_v45 = vld [vmem:[#allocation28_spill] sm:$0xff] }
 0x10a   :  { %vm324_vm4 = vcmp.gt.f32.partialorder %v281_v58, 0.0  ;;  %v327_v54 = vmul.f32 0.01, %v281_v58 }
 0x10b   :  { %v220_v50 = vpop.f32.mrf.mxu2 }
 0x10c   :  { %v240_v46 = vpop.f32.mrf.mxu3  ;;  %v221_v37 = vadd.f32 %v220_v50, %v2106_v4  ;;  %v330_v33 = vsel %vm324_vm4, %v281_v58, %v327_v54  ;;  %v437_v50 = vld [vmem:[%s2613_s4 + $0x8] sm:$0xff] }
 0x10d   :  { %409 = vmatmul.f32.vlgmr.msra.gmra.mxu1 %v330_v33  ;;  %462 = vmatpush.msra.mxu3 %v437_v50  ;;  %v436_v33 = vld [vmem:[%s2613_s4] sm:$0xff]  ;;  %v2871_v50 = vld [vmem:[#allocation7_spill] sm:$0xff] }
 0x10e   :  { %v241_v42 = vadd.f32 %v240_v46, %v221_v37  ;;  %560 = vmatpush.msra.mxu1 %v1313_v14  ;;  %v1112_v14 = vld [vmem:[%s2609_s0 + $0x8] sm:$0xff] }
 0x10f   :  { %463 = vmatpush.msra.mxu3 %v436_v33  ;;  %v2867_v37 = vld [vmem:[#allocation23_spill] sm:$0xff]  ;;  %v2873_v33 = vld [vmem:[#allocation32_spill] sm:$0xff] }
 0x110   :  { %vm323_vm5 = vcmp.gt.f32.partialorder %v241_v42, 0.0  ;;  %v326_v49 = vmul.f32 0.01, %v241_v42  ;;  %561 = vmatpush.msra.mxu1 %v1336_v18 }
 0x111   :  { %580 = vmatpush.msrb.mxu3 %v1329_v17 }
 0x112   :  { %v329_v46 = vsel %vm323_vm5, %v241_v42, %v326_v49  ;;  %562 = vmatpush.msra.mxu1 %v1358_v22  ;;  %v2856_v22 = vld [vmem:[#allocation2_spill] sm:$0xff]  ;;  %v2870_v49 = vld [vmem:[#allocation27_spill] sm:$0xff] }
 0x113   :  { %v300_v54 = vpop.f32.mrf.mxu2  ;;  %389 = vmatmul.f32.vlgmr.msra.gmra.mxu0 %v329_v46  ;;  %581 = vmatpush.msrb.mxu3 %v1341_v19  ;;  %v2855_v19 = vld [vmem:[#allocation9_spill] sm:$0xff]  ;;  %v2872_v46 = vld [vmem:[#allocation34_spill] sm:$0xff] }
 0x114   :  { %v301_v58 = vadd.f32 %v300_v54, %v2122_v59  ;;  %1113 = vmatpush.msk.msra.mxu0 %vm45_vm0, %v1230_v0  ;;  %v320_v18 = vpop.f32.mrf.mxu3  ;;  %563 = vmatpush.msra.mxu1 %v1370_v24  ;;  %v2858_v24 = vld [vmem:[#allocation11_spill] sm:$0xff]  ;;  %v2874_v54 = vld [vmem:[#allocation8_spill] sm:$0xff] }
 0x115   :  { %1116 = vmatmul.msk.f32.vlgmr.msrb.gmra.mxu1 %vm41_vm1, %v1112_v14  ;;  %582 = vmatpush.msrb.mxu3 %v1365_v23  ;;  %v2857_v23 = vld [vmem:[#allocation12_spill] sm:$0xff] }
 0x116   :  { %v321_v42 = vadd.f32 %v320_v18, %v301_v58  ;;  %489 = vmatpush.msra.mxu0 %v1240_v2  ;;  %564 = vmatpush.msra.mxu1 %v1394_v28  ;;  %v2859_v28 = vld [vmem:[#allocation3_spill] sm:$0xff]  ;;  %v2876_v58 = vld [vmem:[#allocation37_spill] sm:$0xff]  ;;  %v2877_v18 = vld [vmem:[#allocation10_spill] sm:$0xff] }
 0x117   :  { %583 = vmatpush.msrb.mxu3 %v1389_v27  ;;  %v2860_v27 = vld [vmem:[#allocation16_spill] sm:$0xff] }
 0x118   :  { %vm325_vm6 = vcmp.gt.f32.partialorder %v321_v42, 0.0  ;;  %v328_v60 = vmul.f32 0.01, %v321_v42  ;;  %565 = vmatpush.msra.mxu1 %v1418_v32  ;;  %v2864_v32 = vld [vmem:[#allocation19_spill] sm:$0xff] }
 0x119   :  { %584 = vmatpush.msrb.mxu3 %v1413_v31  ;;  %v2862_v31 = vld [vmem:[#allocation4_spill] sm:$0xff] }
 0x11a   :  { %v331_v17 = vsel %vm325_vm6, %v321_v42, %v328_v60  ;;  %566 = vmatpush.msra.mxu1 %v1442_v36  ;;  %v2865_v36 = vld [vmem:[#allocation5_spill] sm:$0xff]  ;;  %v2879_v60 = vld [vmem:[#allocation54_spill] sm:$0xff] }
 0x11b   :  { %1110 = vmatmul.msk.f32.vlgmr.msrb.gmra.mxu0 %vm369_vm7, %v331_v17  ;;  %585 = vmatpush.msrb.mxu3 %v2855_v19  ;;  %v2878_v42 = vld [vmem:[#allocation57_spill] sm:$0xff] }
 0x11c   :  { %540 = vmatpush.msrb.mxu0 %v1263_v6  ;;  %567 = vmatpush.msra.mxu1 %v2857_v23  ;;  %v2861_v6 = vld [vmem:[#allocation15_spill] sm:$0xff]  ;;  %v2880_v17 = vld [vmem:[#allocation13_spill] sm:$0xff] }
 0x11d   :  { %586 = vmatpush.msrb.mxu3 %v2858_v24  ;;  %v2881_v19 = vld [vmem:[#allocation61_spill] sm:$0xff]  ;;  %v2883_v23 = vld [vmem:[#allocation75_spill] sm:$0xff] }
 0x11e   :  { %541 = vmatpush.msrb.mxu0 %v1277_v8  ;;  %568 = vmatpush.msra.mxu1 %v2860_v27  ;;  %v2863_v8 = vld [vmem:[#allocation20_spill] sm:$0xff]  ;;  %v2884_v24 = vld [vmem:[#allocation17_spill] sm:$0xff] }
 0x11f   :  { %587 = vmatpush.msrb.mxu3 %v2861_v6  ;;  %v2886_v27 = vld [vmem:[#allocation76_spill] sm:$0xff]  ;;  %v2887_v6 = vld [vmem:[#allocation21_spill] sm:$0xff] }
 0x120   :  { %542 = vmatpush.msrb.mxu0 %v2856_v22  ;;  %569 = vmatpush.msra.mxu1 %v2863_v8  ;;  %v2882_v22 = vld [vmem:[#allocation58_spill] sm:$0xff]  ;;  %v2889_v8 = vld [vmem:[#allocation25_spill] sm:$0xff] }
 0x121   :  { %588 = vmatpush.msrb.mxu3 %v2864_v32  ;;  %v2890_v32 = vld [vmem:[#allocation80_spill] sm:$0xff] }
 0x122   :  { %543 = vmatpush.msrb.mxu0 %v2859_v28  ;;  %570 = vmatpush.msra.mxu1 %v2866_v57  ;;  %v2885_v28 = vld [vmem:[#allocation62_spill] sm:$0xff] }
 0x123   :  { %1114 = vmatmul.msk.f32.vlgmr.msra.gmra.mxu0 %vm41_vm1, %v1112_v14  ;;  %589 = vmatpush.msrb.mxu3 %v2867_v37  ;;  %v2875_v14 = vld [vmem:[#allocation53_spill] sm:$0xff]  ;;  %v2892_v57 = vld [vmem:[#allocation82_spill] sm:$0xff] }
 0x124   :  { %544 = vmatpush.msrb.mxu0 %v2862_v31  ;;  %571 = vmatpush.msra.mxu1 %v2869_v45  ;;  %v2888_v31 = vld [vmem:[#allocation78_spill] sm:$0xff]  ;;  %v2893_v37 = vld [vmem:[#allocation33_spill] sm:$0xff]  ;;  %v2895_v45 = vld [vmem:[#allocation84_spill] sm:$0xff] }
 0x125   :  { %590 = vmatpush.msrb.mxu3 %v2870_v49 }
 0x126   :  { %545 = vmatpush.msrb.mxu0 %v2865_v36  ;;  %572 = vmatpush.msra.mxu1 %v2872_v46  ;;  %v2891_v36 = vld [vmem:[#allocation29_spill] sm:$0xff]  ;;  %v2897_v46 = vld [vmem:[#allocation86_spill] sm:$0xff] }
 0x127   :  { %591 = vmatpush.msrb.mxu3 %v2873_v33 }
 0x128   :  { %546 = vmatpush.msrb.mxu0 %v2868_v41  ;;  %573 = vmatpush.msra.mxu1 %v2875_v14  ;;  %v2894_v41 = vld [vmem:[#allocation35_spill] sm:$0xff] }
 0x129   :  { %592 = vmatpush.msrb.mxu3 %v2876_v58 }
 0x12a   :  { %547 = vmatpush.msrb.mxu0 %v2871_v50  ;;  %574 = vmatpush.msra.mxu1 %v2878_v42  ;;  %v2896_v50 = vld [vmem:[#allocation38_spill] sm:$0xff] }
 0x12b   :  { %593 = vmatpush.msrb.mxu3 %v2879_v60 }
 0x12c   :  { %548 = vmatpush.msrb.mxu0 %v2874_v54  ;;  %575 = vmatpush.msra.mxu1 %v2881_v19  ;;  %v2898_v54 = vld [vmem:[#allocation40_spill] sm:$0xff] }
 0x12d   :  { %594 = vmatpush.msrb.mxu3 %v2882_v22 }
 0x12e   :  { %549 = vmatpush.msrb.mxu0 %v2877_v18  ;;  %652 = vmatpush.msrb.mxu1 %v2883_v23  ;;  %v2899_v18 = vld [vmem:[#allocation88_spill] sm:$0xff] }
 0x12f   :  { %595 = vmatpush.msrb.mxu3 %v2885_v28 }
 0x130   :  { %550 = vmatpush.msrb.mxu0 %v2880_v17  ;;  %653 = vmatpush.msrb.mxu1 %v2886_v27  ;;  %v2900_v17 = vld [vmem:[#allocation42_spill] sm:$0xff] }
 0x132   :  { %551 = vmatpush.msrb.mxu0 %v2884_v24  ;;  %654 = vmatpush.msrb.mxu1 %v2888_v31  ;;  %v2901_v24 = vld [vmem:[#allocation44_spill] sm:$0xff] }
 0x134   :  { %552 = vmatpush.msrb.mxu0 %v2887_v6  ;;  %655 = vmatpush.msrb.mxu1 %v2890_v32  ;;  %v2902_v6 = vld [vmem:[#allocation46_spill] sm:$0xff] }
 0x136   :  { %553 = vmatpush.msrb.mxu0 %v2889_v8  ;;  %656 = vmatpush.msrb.mxu1 %v2892_v57  ;;  %v2903_v8 = vld [vmem:[#allocation48_spill] sm:$0xff] }
 0x138   :  { %554 = vmatpush.msrb.mxu0 %v2891_v36  ;;  %657 = vmatpush.msrb.mxu1 %v2895_v45  ;;  %v2904_v36 = vld [vmem:[#allocation50_spill] sm:$0xff] }
 0x139   :  { %v2911_v45 = vld [vmem:[#allocation70_spill] sm:$0xff] }
 0x13a   :  { %555 = vmatpush.msrb.mxu0 %v2893_v37  ;;  %658 = vmatpush.msrb.mxu1 %v2897_v46  ;;  %v2909_v46 = vld [vmem:[#allocation66_spill] sm:$0xff] }
 0x13c   :  { %620 = vmatpush.msra.mxu0 %v2894_v41  ;;  %659 = vmatpush.msrb.mxu1 %v2899_v18  ;;  %v2905_v18 = vld [vmem:[#allocation52_spill] sm:$0xff] }
 0x13e   :  { %621 = vmatpush.msra.mxu0 %v2896_v50  ;;  %660 = vmatpush.msrb.mxu1 %v1944_v48  ;;  %v2906_v48 = vld [vmem:[#allocation56_spill] sm:$0xff] }
 0x140   :  { %622 = vmatpush.msra.mxu0 %v2898_v54  ;;  %661 = vmatpush.msrb.mxu1 %v2004_v10  ;;  %v2907_v10 = vld [vmem:[#allocation60_spill] sm:$0xff] }
 0x142   :  { %623 = vmatpush.msra.mxu0 %v2900_v17  ;;  %662 = vmatpush.msrb.mxu1 %v2016_v15  ;;  %v2908_v15 = vld [vmem:[#allocation64_spill] sm:$0xff] }
 0x144   :  { %624 = vmatpush.msra.mxu0 %v2901_v24  ;;  %663 = vmatpush.msrb.mxu1 %v2028_v39  ;;  %v2910_v39 = vld [vmem:[#allocation68_spill] sm:$0xff] }
 0x146   :  { %625 = vmatpush.msra.mxu0 %v2902_v6  ;;  %664 = vmatpush.msrb.mxu1 %v2040_v51  ;;  %v2912_v51 = vld [vmem:[#allocation72_spill] sm:$0xff] }
 0x148   :  { %626 = vmatpush.msra.mxu0 %v2903_v8  ;;  %665 = vmatpush.msrb.mxu1 %v2052_v25  ;;  %v2222_v25 = vld [vmem:[%s2612_s7 + $0x2] ss:$0 sm:$0xff] }
 0x14a   :  { %627 = vmatpush.msra.mxu0 %v2904_v36  ;;  %666 = vmatpush.msrb.mxu1 %v2060_v56  ;;  %v2913_v36 = vld [vmem:[#allocation73_spill] sm:$0xff] }
 0x14c   :  { %628 = vmatpush.msra.mxu0 %v2905_v18  ;;  %667 = vmatpush.msrb.mxu1 %v2065_v55 }
 0x14e   :  { %629 = vmatpush.msra.mxu0 %v2906_v48 }
 0x150   :  { %630 = vmatpush.msra.mxu0 %v2907_v10 }
 0x152   :  { %631 = vmatpush.msra.mxu0 %v2908_v15 }
 0x154   :  { %632 = vmatpush.msra.mxu0 %v2909_v46 }
 0x156   :  { %633 = vmatpush.msra.mxu0 %v2910_v39 }
 0x158   :  { %634 = vmatpush.msra.mxu0 %v2911_v45 }
 0x15a   :  { %635 = vmatpush.msra.mxu0 %v2912_v51 }
 0x18a   :  { %v410_v57 = vpop.f32.mrf.mxu1 }
 0x190   :  { %v390_v56 = vpop.f32.mrf.mxu0 }
 0x191   :  { %v391_v10 = vadd.f32 %v390_v56, %v2222_v25 }
 0x192   :  { %v511_v55 = vpop.f32.mrf.mxu1 }
 0x193   :  { %v512_v15 = vadd.f32 %v511_v55, %v1938_v44  ;;  %v411_v48 = vadd.f32 %v410_v57, %v391_v10  ;;  %v2914_v55 = vld [vmem:[#allocation74_spill] sm:$0xff]  ;;  %v2915_v57 = vld [vmem:[#allocation77_spill] sm:$0xff] }
 0x195   :  { %vm515_vm8 = vcmp.gt.f32.partialorder %v512_v15, 0.0  ;;  %v517_v46 = vmul.f32 0.01, %v512_v15 }
 0x197   :  { %v519_v18 = vsel %vm515_vm8, %v512_v15, %v517_v46  ;;  %v2916_v15 = vld [vmem:[#allocation79_spill] sm:$0xff]  ;;  %vm1099_vm8 = vcmask 56320  }
 0x198   :  { %v430_v39 = vpop.f32.mrf.mxu0  ;;  %556 = vmatmul.f32.vlgmr.msrb.gmra.mxu0 %v519_v18 }
 0x199   :  { %v431_v45 = vadd.f32 %v430_v39, %v411_v48  ;;  %v2917_v39 = vld [vmem:[#allocation81_spill] sm:$0xff] }
 0x19b   :  { %vm433_vm9 = vcmp.gt.f32.partialorder %v431_v45, 0.0  ;;  %v434_v51 = vmul.f32 0.01, %v431_v45 }
 0x19d   :  { %v435_v32 = vsel %vm433_vm9, %v431_v45, %v434_v51  ;;  %v2918_v51 = vld [vmem:[#allocation83_spill] sm:$0xff]  ;;  %v2921_v45 = vld [vmem:[#allocation89_spill] sm:$0xff] }
 0x19e   :  { %1111 = vmatmul.msk.f32.vlgmr.msra.gmra.mxu3 %vm444_vm10, %v435_v32  ;;  %v2920_v32 = vld [vmem:[#allocation87_spill] sm:$0xff] }
 0x19f   :  { %672 = vmatpush.msra.mxu3 %v2913_v36 }
 0x1a0   :  { %v491_v31 = vpop.f32.mrf.mxu0  ;;  %636 = vmatmul.f32.vlgmr.msra.gmra.mxu0 %v519_v18 }
 0x1a1   :  { %v492_v56 = vadd.f32 %v491_v31, %v1936_v43  ;;  %673 = vmatpush.msra.mxu3 %v2914_v55  ;;  %v2919_v31 = vld [vmem:[#allocation85_spill] sm:$0xff] }
 0x1a3   :  { %vm514_vm11 = vcmp.gt.f32.partialorder %v492_v56, 0.0  ;;  %v516_v10 = vmul.f32 0.01, %v492_v56  ;;  %674 = vmatpush.msra.mxu3 %v2915_v57 }
 0x1a5   :  { %v518_v48 = vsel %vm514_vm11, %v492_v56, %v516_v10  ;;  %675 = vmatpush.msra.mxu3 %v2916_v15 }
 0x1a6   :  { %536 = vmatmul.f32.vlgmr.msra.gmra.mxu2 %v518_v48  ;;  %576 = vmatmul.f32.vlgmr.msra.gmra.mxu1 %v518_v48 }
 0x1a7   :  { %596 = vmatmul.f32.vlgmr.msrb.gmra.mxu3 %v519_v18  ;;  %704 = vmatpush.msra.mxu2 %v2073_v61  ;;  %v1120_v18 = vld [vmem:[%s2613_s4 + $0x50] sm:$0xff] }
 0x1a8   :  { %676 = vmatpush.msra.mxu3 %v2917_v39  ;;  %1128 = vmatpush.msk.msra.mxu1 %vm45_vm0, %v1230_v0  ;;  %v2922_v0 = vld [vmem:[#allocation14_spill] sm:$0xff] }
 0x1a9   :  { %705 = vmatpush.msra.mxu2 %v2079_v62 }
 0x1aa   :  { %677 = vmatpush.msra.mxu3 %v2918_v51  ;;  %768 = vmatpush.msra.mxu1 %v1240_v2  ;;  %v2924_v2 = vld [vmem:[#allocation22_spill] sm:$0xff] }
 0x1ab   :  { %706 = vmatpush.msra.mxu2 %v2085_v63 }
 0x1ac   :  { %678 = vmatpush.msra.mxu3 %v2919_v31 }
 0x1ad   :  { %707 = vmatpush.msra.mxu2 %v2091_v29 }
 0x1ae   :  { %616 = vmatmul.f32.vlgmr.msrb.gmra.mxu2 %v518_v48  ;;  %679 = vmatpush.msra.mxu3 %v2920_v32 }
 0x1af   :  { %1130 = vmatpush.msk.msrb.mxu2 %vm45_vm0, %v1235_v1  ;;  %v2923_v1 = vld [vmem:[#allocation18_spill] sm:$0xff] }
 0x1b0   :  { %680 = vmatpush.msra.mxu3 %v2921_v45 }
 0x1b1   :  { %788 = vmatpush.msrb.mxu2 %v1249_v3  ;;  %v2925_v3 = vld [vmem:[#allocation26_spill] sm:$0xff] }
 0x1b2   :  { %681 = vmatpush.msra.mxu3 %v1949_v53 }
 0x1b4   :  { %682 = vmatpush.msra.mxu3 %v1956_v20 }
 0x1b6   :  { %683 = vmatpush.msra.mxu3 %v1965_v47 }
 0x1b8   :  { %684 = vmatpush.msra.mxu3 %v2009_v12 }
 0x1ba   :  { %685 = vmatpush.msra.mxu3 %v2021_v35 }
 0x1bc   :  { %686 = vmatpush.msra.mxu3 %v2033_v40 }
 0x1be   :  { %687 = vmatpush.msra.mxu3 %v2045_v52 }
 0x1c0   :  { %799 = vmatpush.msrb.mxu3 %v1257_v5  ;;  %v2926_v5 = vld [vmem:[#allocation30_spill] sm:$0xff] }
 0x1c2   :  { %800 = vmatpush.msrb.mxu3 %v1268_v7 }
 0x1c4   :  { %801 = vmatpush.msrb.mxu3 %v1282_v9  ;;  %v1125_v9 = vld [vmem:[%s2613_s4 + $0x78] sm:$0xff] }
 0x1c5   :  { %735 = vmatpush.msrb.mxu0 %v1125_v9 }
 0x1c6   :  { %802 = vmatpush.msrb.mxu3 %v1294_v11  ;;  %v1124_v11 = vld [vmem:[%s2613_s4 + $0x70] sm:$0xff] }
 0x1c7   :  { %736 = vmatpush.msrb.mxu0 %v1124_v11 }
 0x1c8   :  { %803 = vmatpush.msrb.mxu3 %v1306_v13  ;;  %v1123_v13 = vld [vmem:[%s2613_s4 + $0x68] sm:$0xff] }
 0x1c9   :  { %737 = vmatpush.msrb.mxu0 %v1123_v13 }
 0x1ca   :  { %804 = vmatpush.msrb.mxu3 %v1323_v16  ;;  %v1122_v16 = vld [vmem:[%s2613_s4 + $0x60] sm:$0xff] }
 0x1cb   :  { %738 = vmatpush.msrb.mxu0 %v1122_v16  ;;  %v2928_v16 = vld [vmem:[#allocation31_spill] sm:$0xff] }
 0x1cc   :  { %805 = vmatpush.msrb.mxu3 %v1351_v21 }
 0x1ce   :  { %806 = vmatpush.msrb.mxu3 %v1380_v26  ;;  %v1121_v26 = vld [vmem:[%s2613_s4 + $0x58] sm:$0xff] }
 0x1cf   :  { %739 = vmatpush.msrb.mxu0 %v1121_v26  ;;  %v1144_v26 = vld [vmem:[%s2610_s2 + $0x2e8] sm:$0xff] }
 0x1d0   :  { %807 = vmatpush.msrb.mxu3 %v1404_v30 }
 0x1d1   :  { %740 = vmatpush.msrb.mxu0 %v1120_v18 }
 0x1d2   :  { %808 = vmatpush.msrb.mxu3 %v1428_v34  ;;  %v2927_v34 = vld [vmem:[#allocation98_spill] sm:$0xff] }
 0x1d4   :  { %809 = vmatpush.msrb.mxu3 %v1452_v38 }
 0x1d6   :  { %810 = vmatpush.msrb.mxu3 %v2922_v0  ;;  %v1119_v0 = vld [vmem:[%s2613_s4 + $0x48] sm:$0xff] }
 0x1d7   :  { %741 = vmatpush.msrb.mxu0 %v1119_v0 }
 0x1d8   :  { %811 = vmatpush.msrb.mxu3 %v2923_v1 }
 0x1da   :  { %812 = vmatpush.msrb.mxu3 %v2924_v2 }
 0x1dc   :  { %813 = vmatpush.msrb.mxu3 %v2925_v3  ;;  %v1118_v3 = vld [vmem:[%s2613_s4 + $0x40] sm:$0xff] }
 0x1dd   :  { %742 = vmatpush.msrb.mxu0 %v1118_v3  ;;  %v1149_v3 = vld [vmem:[%s2610_s2 + $0x2c0] sm:$0xff] }
 0x1de   :  { %814 = vmatpush.msrb.mxu3 %v2926_v5 }
 0x215   :  { %v557_v30 = vpop.f32.mrf.mxu0 }
 0x221   :  { %v2270_v7 = vpop.f32.mrf.mxu3 }
 0x223   :  { %v577_v21 = vpop.f32.mrf.mxu1 }
 0x224   :  { %v578_v38 = vadd.f32 %v577_v21, %v2927_v34 }
 0x229   :  { %v537_v46 = vpop.f32.mrf.mxu2 }
 0x22a   :  { %v538_v56 = vadd.f32 %v537_v46, %v2106_v4  ;;  %v597_v10 = vpop.f32.mrf.mxu3  ;;  %v2929_v46 = vld [vmem:[#allocation36_spill] sm:$0xff] }
 0x22b   :  { %v598_v48 = vadd.f32 %v597_v10, %v578_v38  ;;  %v637_v38 = vpop.f32.mrf.mxu0  ;;  %v1147_v10 = vld [vmem:[%s2610_s2 + $0x2d8] sm:$0xff] }
 0x22c   :  { %v558_v1 = vadd.f32 %v557_v30, %v538_v56  ;;  %v1145_v30 = vld [vmem:[%s2610_s2 + $0x2f0] sm:$0xff] }
 0x22d   :  { %vm641_vm12 = vcmp.gt.f32.partialorder %v598_v48, 0.0  ;;  %v644_v2 = vmul.f32 0.01, %v598_v48  ;;  %859 = vmatpush.msra.mxu0 %v1145_v30  ;;  %v1146_v56 = vld [vmem:[%s2610_s2 + $0x2d0] sm:$0xff] }
 0x22e   :  { %v643_v5 = vmul.f32 0.01, %v558_v1  ;;  %vm640_vm13 = vcmp.gt.f32.partialorder %v558_v1, 0.0  ;;  %v1154_v30 = vld [vmem:[%s2610_s2 + $0x290] sm:$0xff] }
 0x22f   :  { %v647_v9 = vsel %vm641_vm12, %v598_v48, %v644_v2  ;;  %860 = vmatpush.msra.mxu0 %v1147_v10  ;;  %v2930_v48 = vld [vmem:[#allocation39_spill] sm:$0xff]  ;;  %v1148_v2 = vld [vmem:[%s2610_s2 + $0x2b8] sm:$0xff] }
 0x230   :  { %688 = vmatmul.f32.vlgmr.msra.gmra.mxu3 %v647_v9  ;;  %v646_v11 = vsel %vm640_vm13, %v558_v1, %v643_v5  ;;  %v1127_v1 = vld [vmem:[%s2609_s0 + $0x10] sm:$0xff]  ;;  %v2931_v5 = vld [vmem:[#allocation41_spill] sm:$0xff] }
 0x231   :  { %v617_v13 = vpop.f32.mrf.mxu2  ;;  %668 = vmatmul.f32.vlgmr.msrb.gmra.mxu1 %v646_v11  ;;  %879 = vmatpush.msra.mxu3 %v2928_v16  ;;  %v1150_v11 = vld [vmem:[%s2610_s2 + $0x2a0] sm:$0xff]  ;;  %v1152_v16 = vld [vmem:[%s2610_s2 + $0x288] sm:$0xff]  ;;  %v1158_v10 = vld [vmem:[%s2610_s2 + $0x258] sm:$0xff] }
 0x232   :  { %v618_v21 = vadd.f32 %v617_v13, %v2122_v59  ;;  %819 = vmatpush.msrb.mxu1 %v1144_v26  ;;  %861 = vmatpush.msra.mxu0 %v1149_v3  ;;  %v1151_v13 = vld [vmem:[%s2610_s2 + $0x2a8] sm:$0xff]  ;;  %v1161_v3 = vld [vmem:[%s2610_s2 + $0x240] sm:$0xff] }
 0x233   :  { %880 = vmatpush.msra.mxu3 %v2929_v46  ;;  %v2932_v26 = vld [vmem:[#allocation43_spill] sm:$0xff]  ;;  %v1156_v46 = vld [vmem:[%s2610_s2 + $0x158] sm:$0xff] }
 0x234   :  { %v638_v18 = vadd.f32 %v637_v38, %v618_v21  ;;  %820 = vmatpush.msrb.mxu1 %v1146_v56  ;;  %862 = vmatpush.msra.mxu0 %v1151_v13  ;;  %v1153_v21 = vld [vmem:[%s2610_s2 + $0x170] sm:$0xff]  ;;  %v1157_v56 = vld [vmem:[%s2610_s2 + $0x278] sm:$0xff] }
 0x235   :  { %881 = vmatpush.msra.mxu3 %v2930_v48  ;;  %v1155_v38 = vld [vmem:[%s2610_s2 + $0x270] sm:$0xff]  ;;  %v1159_v48 = vld [vmem:[%s2610_s2 + $0x140] sm:$0xff] }
 0x236   :  { %vm642_vm14 = vcmp.gt.f32.partialorder %v638_v18, 0.0  ;;  %v645_v0 = vmul.f32 0.01, %v638_v18  ;;  %821 = vmatpush.msrb.mxu1 %v1148_v2  ;;  %863 = vmatpush.msra.mxu0 %v1154_v30  ;;  %v1160_v2 = vld [vmem:[%s2610_s2 + $0x260] sm:$0xff]  ;;  %v1164_v13 = vld [vmem:[%s2610_s2 + $0x110] sm:$0xff]  ;;  %v2937_v30 = vld [vmem:[#allocation55_spill] sm:$0xff] }
 0x237   :  { %882 = vmatpush.msra.mxu3 %v2931_v5  ;;  %v1162_v5 = vld [vmem:[%s2610_s2 + $0x128] sm:$0xff] }
 0x238   :  { %v648_v9 = vsel %vm642_vm14, %v638_v18, %v645_v0  ;;  %822 = vmatpush.msrb.mxu1 %v1150_v11  ;;  %v2933_v18 = vld [vmem:[#allocation45_spill] sm:$0xff]  ;;  %864 = vmatpush.msra.mxu0 %v1157_v56  ;;  %v2934_v0 = vld [vmem:[#allocation47_spill] sm:$0xff] }
 0x239   :  { %1117 = vmatmul.msk.f32.vlgmr.msra.gmra.mxu2 %vm369_vm7, %v648_v9  ;;  %1129 = vmatmul.msk.f32.vlgmr.msra.gmra.mxu1 %vm41_vm1, %v1127_v1  ;;  %v2935_v9 = vld [vmem:[#allocation49_spill] sm:$0xff]  ;;  %v1163_v11 = vld [vmem:[%s2610_s2 + $0x228] sm:$0xff] }
 0x23a   :  { %823 = vmatpush.msrb.mxu1 %v1152_v16  ;;  %839 = vmatpush.msra.mxu2 %v1153_v21  ;;  %v2936_v16 = vld [vmem:[#allocation51_spill] sm:$0xff] }
 0x23b   :  { %883 = vmatpush.msra.mxu3 %v2932_v26  ;;  %865 = vmatpush.msra.mxu0 %v1160_v2  ;;  %v1165_v21 = vld [vmem:[%s2610_s2 + $0x248] sm:$0xff]  ;;  %v1167_v26 = vld [vmem:[%s2610_s2 + $0xf8] sm:$0xff] }
 0x23c   :  { %824 = vmatpush.msrb.mxu1 %v1155_v38  ;;  %840 = vmatpush.msra.mxu2 %v1156_v46  ;;  %v1168_v38 = vld [vmem:[%s2610_s2 + $0x230] sm:$0xff]  ;;  %v1169_v46 = vld [vmem:[%s2610_s2 + $0x1f8] sm:$0xff]  ;;  %v2938_v56 = vld [vmem:[#allocation59_spill] sm:$0xff] }
 0x23d   :  { %884 = vmatpush.msra.mxu3 %v2933_v18  ;;  %866 = vmatpush.msra.mxu0 %v1165_v21  ;;  %v1170_v18 = vld [vmem:[%s2610_s2 + $0xe0] sm:$0xff]  ;;  %v2939_v2 = vld [vmem:[#allocation63_spill] sm:$0xff]  ;;  %v2942_v21 = vld [vmem:[#allocation69_spill] sm:$0xff] }
 0x23e   :  { %825 = vmatpush.msrb.mxu1 %v1158_v10  ;;  %841 = vmatpush.msra.mxu2 %v1159_v48  ;;  %v1171_v10 = vld [vmem:[%s2610_s2 + $0x218] sm:$0xff]  ;;  %v1172_v48 = vld [vmem:[%s2610_s2 + $0x1e0] sm:$0xff] }
 0x23f   :  { %885 = vmatpush.msra.mxu3 %v2934_v0  ;;  %867 = vmatpush.msra.mxu0 %v1168_v38  ;;  %v1173_v0 = vld [vmem:[%s2610_s2 + $0xc8] sm:$0xff]  ;;  %v2961_v38 = vld [vmem:[#allocation72_spill] sm:$0xff] }
 0x240   :  { %826 = vmatpush.msrb.mxu1 %v1161_v3  ;;  %842 = vmatpush.msra.mxu2 %v1162_v5  ;;  %v1174_v3 = vld [vmem:[%s2610_s2 + $0x1c8] sm:$0xff]  ;;  %v1175_v5 = vld [vmem:[%s2610_s2 + $0xb0] sm:$0xff] }
 0x241   :  { %1131 = vmatmul.msk.f32.vlgmr.msrb.gmra.mxu2 %vm41_vm1, %v1127_v1  ;;  %886 = vmatpush.msra.mxu3 %v2935_v9  ;;  %v1166_v1 = vld [vmem:[%s2610_s2 + $0x210] sm:$0xff]  ;;  %v2940_v9 = vld [vmem:[#allocation65_spill] sm:$0xff] }
 0x242   :  { %827 = vmatpush.msrb.mxu1 %v1163_v11  ;;  %843 = vmatpush.msra.mxu2 %v1164_v13  ;;  %v1176_v11 = vld [vmem:[%s2610_s2 + $0x1b0] sm:$0xff]  ;;  %v2941_v13 = vld [vmem:[#allocation67_spill] sm:$0xff] }
 0x243   :  { %887 = vmatpush.msra.mxu3 %v2936_v16  ;;  %868 = vmatpush.msra.mxu0 %v1171_v10  ;;  %v1178_v16 = vld [vmem:[%s2610_s2 + $0x198] sm:$0xff]  ;;  %v2965_v10 = vld [vmem:[#allocation96_spill] sm:$0xff] }
 0x244   :  { %828 = vmatpush.msrb.mxu1 %v1166_v1  ;;  %844 = vmatpush.msra.mxu2 %v1167_v26  ;;  %v2943_v1 = vld [vmem:[#allocation71_spill] sm:$0xff]  ;;  %v1181_v26 = vld [vmem:[%s2610_s2 + $0x50] sm:$0xff] }
 0x245   :  { %888 = vmatpush.msra.mxu3 %v2937_v30  ;;  %869 = vmatpush.msra.mxu0 %v2870_v49  ;;  %v1177_v49 = vld [vmem:[%s2610_s2 + $0x98] sm:$0xff]  ;;  %v2960_v30 = vld [vmem:[#allocation92_spill] sm:$0xff] }
 0x246   :  { %829 = vmatpush.msrb.mxu1 %v1169_v46  ;;  %845 = vmatpush.msra.mxu2 %v1170_v18  ;;  %v2962_v46 = vld [vmem:[#allocation93_spill] sm:$0xff]  ;;  %v2963_v18 = vld [vmem:[#allocation94_spill] sm:$0xff] }
 0x247   :  { %889 = vmatpush.msra.mxu3 %v2938_v56  ;;  %870 = vmatpush.msra.mxu0 %v2873_v33  ;;  %v1179_v33 = vld [vmem:[%s2610_s2 + $0x80] sm:$0xff]  ;;  %v2964_v56 = vld [vmem:[#allocation95_spill] sm:$0xff] }
 0x248   :  { %830 = vmatpush.msrb.mxu1 %v1172_v48  ;;  %846 = vmatpush.msra.mxu2 %v1173_v0  ;;  %v2966_v48 = vld [vmem:[#allocation97_spill] sm:$0xff] }
 0x249   :  { %890 = vmatpush.msra.mxu3 %v2939_v2  ;;  %871 = vmatpush.msra.mxu0 %v2876_v58  ;;  %v1180_v58 = vld [vmem:[%s2610_s2 + $0x68] sm:$0xff] }
 0x24a   :  { %831 = vmatpush.msrb.mxu1 %v1174_v3  ;;  %847 = vmatpush.msra.mxu2 %v1175_v5 }
 0x24b   :  { %891 = vmatpush.msra.mxu3 %v2940_v9  ;;  %872 = vmatpush.msra.mxu0 %v2879_v60  ;;  %v2945_v60 = vld [vmem:[#allocation50_spill] sm:$0xff] }
 0x24c   :  { %832 = vmatpush.msrb.mxu1 %v1176_v11  ;;  %848 = vmatpush.msra.mxu2 %v1177_v49 }
 0x24d   :  { %892 = vmatpush.msra.mxu3 %v2941_v13  ;;  %873 = vmatpush.msra.mxu0 %v2882_v22  ;;  %v2946_v22 = vld [vmem:[#allocation80_spill] sm:$0xff] }
 0x24e   :  { %833 = vmatpush.msrb.mxu1 %v1178_v16  ;;  %849 = vmatpush.msra.mxu2 %v1179_v33 }
 0x24f   :  { %893 = vmatpush.msra.mxu3 %v2942_v21  ;;  %874 = vmatpush.msra.mxu0 %v2885_v28  ;;  %v2948_v28 = vld [vmem:[#allocation82_spill] sm:$0xff] }
 0x250   :  { %834 = vmatpush.msrb.mxu1 %v2893_v37  ;;  %850 = vmatpush.msra.mxu2 %v1180_v58  ;;  %v2950_v37 = vld [vmem:[#allocation84_spill] sm:$0xff] }
 0x251   :  { %894 = vmatpush.msra.mxu3 %v2943_v1 }
 0x252   :  { %899 = vmatpush.msra.mxu1 %v2894_v41  ;;  %851 = vmatpush.msra.mxu2 %v1181_v26  ;;  %v2952_v41 = vld [vmem:[#allocation86_spill] sm:$0xff]  ;;  %v1140_v26 = vld [vmem:[%s2613_s4 + $0xb8] sm:$0xff] }
 0x254   :  { %900 = vmatpush.msra.mxu1 %v2896_v50  ;;  %852 = vmatpush.msra.mxu2 %v2875_v14  ;;  %v2944_v14 = vld [vmem:[#allocation78_spill] sm:$0xff]  ;;  %v2954_v50 = vld [vmem:[#allocation88_spill] sm:$0xff] }
 0x256   :  { %901 = vmatpush.msra.mxu1 %v2898_v54  ;;  %853 = vmatpush.msra.mxu2 %v2878_v42  ;;  %v2947_v42 = vld [vmem:[#allocation52_spill] sm:$0xff]  ;;  %v2955_v54 = vld [vmem:[#allocation66_spill] sm:$0xff] }
 0x258   :  { %902 = vmatpush.msra.mxu1 %v2900_v17  ;;  %854 = vmatpush.msra.mxu2 %v2881_v19  ;;  %v2949_v19 = vld [vmem:[#allocation56_spill] sm:$0xff]  ;;  %v2956_v17 = vld [vmem:[#allocation90_spill] sm:$0xff] }
 0x25a   :  { %903 = vmatpush.msra.mxu1 %v2901_v24  ;;  %931 = vmatpush.msrb.mxu2 %v2883_v23  ;;  %v2951_v23 = vld [vmem:[#allocation60_spill] sm:$0xff] }
 0x25b   :  { %v2957_v24 = vld [vmem:[#allocation68_spill] sm:$0xff] }
 0x25c   :  { %904 = vmatpush.msra.mxu1 %v2902_v6  ;;  %932 = vmatpush.msrb.mxu2 %v2886_v27  ;;  %v2953_v27 = vld [vmem:[#allocation64_spill] sm:$0xff]  ;;  %v2958_v6 = vld [vmem:[#allocation91_spill] sm:$0xff] }
 0x25e   :  { %905 = vmatpush.msra.mxu1 %v2903_v8  ;;  %933 = vmatpush.msrb.mxu2 %v2944_v14  ;;  %v2959_v8 = vld [vmem:[#allocation70_spill] sm:$0xff]  ;;  %v1139_v14 = vld [vmem:[%s2613_s4 + $0xb0] sm:$0xff] }
 0x260   :  { %906 = vmatpush.msra.mxu1 %v2945_v60  ;;  %934 = vmatpush.msrb.mxu2 %v2946_v22  ;;  %v1137_v60 = vld [vmem:[%s2613_s4 + $0xa0] sm:$0xff]  ;;  %v1136_v22 = vld [vmem:[%s2613_s4 + $0x98] sm:$0xff] }
 0x262   :  { %907 = vmatpush.msra.mxu1 %v2947_v42  ;;  %935 = vmatpush.msrb.mxu2 %v2948_v28  ;;  %v1135_v42 = vld [vmem:[%s2613_s4 + $0x90] sm:$0xff]  ;;  %v1134_v28 = vld [vmem:[%s2613_s4 + $0x88] sm:$0xff] }
 0x264   :  { %908 = vmatpush.msra.mxu1 %v2949_v19  ;;  %936 = vmatpush.msrb.mxu2 %v2950_v37  ;;  %v1133_v19 = vld [vmem:[%s2613_s4 + $0x80] sm:$0xff]  ;;  %v1041_v37 = vld [vmem:[%s2614_s5 + $0x58] sm:$0xff] }
 0x266   :  { %909 = vmatpush.msra.mxu1 %v2951_v23  ;;  %937 = vmatpush.msrb.mxu2 %v2952_v41  ;;  %v1040_v23 = vld [vmem:[%s2614_s5 + $0x50] sm:$0xff]  ;;  %v1039_v41 = vld [vmem:[%s2614_s5 + $0x48] sm:$0xff] }
 0x268   :  { %910 = vmatpush.msra.mxu1 %v2953_v27  ;;  %938 = vmatpush.msrb.mxu2 %v2954_v50  ;;  %v1038_v27 = vld [vmem:[%s2614_s5 + $0x40] sm:$0xff]  ;;  %v1037_v50 = vld [vmem:[%s2614_s5 + $0x38] sm:$0xff] }
 0x26a   :  { %911 = vmatpush.msra.mxu1 %v2955_v54  ;;  %939 = vmatpush.msrb.mxu2 %v2956_v17  ;;  %v1036_v54 = vld [vmem:[%s2614_s5 + $0x30] sm:$0xff]  ;;  %v1035_v17 = vld [vmem:[%s2614_s5 + $0x28] sm:$0xff] }
 0x26c   :  { %912 = vmatpush.msra.mxu1 %v2957_v24  ;;  %940 = vmatpush.msrb.mxu2 %v2958_v6  ;;  %v1034_v24 = vld [vmem:[%s2614_s5 + $0x20] sm:$0xff]  ;;  %v1033_v6 = vld [vmem:[%s2614_s5 + $0x18] sm:$0xff] }
 0x26e   :  { %913 = vmatpush.msra.mxu1 %v2959_v8  ;;  %941 = vmatpush.msrb.mxu2 %v2960_v30 }
 0x270   :  { %914 = vmatpush.msra.mxu1 %v2961_v38  ;;  %942 = vmatpush.msrb.mxu2 %v2962_v46 }
 0x272   :  { %943 = vmatpush.msrb.mxu2 %v2963_v18 }
 0x274   :  { %944 = vmatpush.msrb.mxu2 %v2964_v56 }
 0x276   :  { %945 = vmatpush.msrb.mxu2 %v2965_v10 }
 0x278   :  { %946 = vmatpush.msrb.mxu2 %v2966_v48 }
 0x2ae   :  { %v669_v0 = vpop.f32.mrf.mxu1 }
 0x2af   :  { %v670_v9 = vadd.f32 %v669_v0, %v2222_v25  ;;  %v1032_v0 = vld [vmem:[%s2614_s5 + $0x10] sm:$0xff] }
 0x2b3   :  { %v689_v5 = vpop.f32.mrf.mxu3 }
 0x2b4   :  { %v690_v49 = vadd.f32 %v689_v5, %v670_v9  ;;  %v1073_v5 = vld [vmem:[%s2615_s6 + $0x30] sm:$0xff]  ;;  %v1072_v9 = vld [vmem:[%s2615_s6 + $0x28] sm:$0xff] }
 0x2b6   :  { %v770_v2 = vpop.f32.mrf.mxu1 }
 0x2b7   :  { %v771_v3 = vadd.f32 %v770_v2, %v1936_v43  ;;  %v1031_v2 = vld [vmem:[%s2614_s5 + $0x8] sm:$0xff] }
 0x2b9   :  { %vm793_vm15 = vcmp.gt.f32.partialorder %v771_v3, 0.0  ;;  %v795_v11 = vmul.f32 0.01, %v771_v3 }
 0x2bb   :  { %v797_v13 = vsel %vm793_vm15, %v771_v3, %v795_v11  ;;  %v1074_v3 = vld [vmem:[%s2615_s6 + $0x38] sm:$0xff]  ;;  %v1071_v11 = vld [vmem:[%s2615_s6 + $0x20] sm:$0xff] }
 0x2bc   :  { %v709_v16 = vpop.f32.mrf.mxu2  ;;  %815 = vmatmul.f32.vlgmr.msrb.gmra.mxu3 %v797_v13  ;;  %855 = vmatmul.f32.vlgmr.msra.gmra.mxu2 %v797_v13 }
 0x2bd   :  { %v710_v33 = vadd.f32 %v709_v16, %v690_v49  ;;  %983 = vmatpush.msrb.mxu3 %v2073_v61  ;;  %1051 = vmatpush.msra.mxu2 %v1041_v37  ;;  %v1070_v49 = vld [vmem:[%s2615_s6 + $0x18] sm:$0xff] }
 0x2bf   :  { %vm712_vm0 = vcmp.gt.f32.partialorder %v710_v33, 0.0  ;;  %v713_v21 = vmul.f32 0.01, %v710_v33  ;;  %984 = vmatpush.msrb.mxu3 %v2079_v62  ;;  %1052 = vmatpush.msra.mxu2 %v1040_v23 }
 0x2c1   :  { %v714_v58 = vsel %vm712_vm0, %v710_v33, %v713_v21  ;;  %985 = vmatpush.msrb.mxu3 %v2085_v63  ;;  %1053 = vmatpush.msra.mxu2 %v1039_v41 }
 0x2c2   :  { %1126 = vmatmul.msk.f32.vlgmr.msrb.gmra.mxu0 %vm444_vm10, %v714_v58 }
 0x2c3   :  { %951 = vmatpush.msrb.mxu0 %v2913_v36  ;;  %986 = vmatpush.msrb.mxu3 %v2091_v29  ;;  %v29_v29 = vld [vmem:[%s2612_s7 + $0x3] ss:$0 sm:$0xff] }
 0x2c4   :  { %v790_v43 = vpop.f32.mrf.mxu2  ;;  %895 = vmatmul.f32.vlgmr.msra.gmra.mxu3 %v797_v13  ;;  %1054 = vmatpush.msra.mxu2 %v1038_v27  ;;  %v1069_v13 = vld [vmem:[%s2615_s6 + $0x10] sm:$0xff] }
 0x2c5   :  { %v791_v1 = vadd.f32 %v790_v43, %v1938_v44  ;;  %952 = vmatpush.msrb.mxu0 %v2914_v55  ;;  %v468_v44 = vadd.f32 %v2270_v7, %v29_v29  ;;  %1087 = vmatpush.msra.mxu3 %v1074_v3  ;;  %v1068_v43 = vld [vmem:[%s2615_s6 + $0x8] sm:$0xff] }
 0x2c6   :  { %1055 = vmatpush.msra.mxu2 %v1037_v50 }
 0x2c7   :  { %vm794_vm1 = vcmp.gt.f32.partialorder %v791_v1, 0.0  ;;  %v796_v61 = vmul.f32 0.01, %v791_v1  ;;  %953 = vmatpush.msrb.mxu0 %v2915_v57  ;;  %1088 = vmatpush.msra.mxu3 %v1073_v5 }
 0x2c8   :  { %1056 = vmatpush.msra.mxu2 %v1036_v54 }
 0x2c9   :  { %v798_v62 = vsel %vm794_vm1, %v791_v1, %v796_v61  ;;  %954 = vmatpush.msrb.mxu0 %v2916_v15  ;;  %1089 = vmatpush.msra.mxu3 %v1072_v9  ;;  %v1067_v1 = vld [vmem:[%s2615_s6] sm:$0xff] }
 0x2ca   :  { %835 = vmatmul.f32.vlgmr.msrb.gmra.mxu1 %v798_v62  ;;  %875 = vmatmul.f32.vlgmr.msra.gmra.mxu0 %v798_v62  ;;  %v1042_v61 = vld [vmem:[%s2612_s7 + $0x4] ss:$0 sm:$0xff] }
 0x2cb   :  { %955 = vmatpush.msrb.mxu0 %v2917_v39  ;;  %1014 = vmatpush.msrb.mxu1 %v1140_v26 }
 0x2cc   :  { %1057 = vmatpush.msra.mxu2 %v1035_v17  ;;  %1090 = vmatpush.msra.mxu3 %v1071_v11 }
 0x2cd   :  { %956 = vmatpush.msrb.mxu0 %v2918_v51  ;;  %1015 = vmatpush.msrb.mxu1 %v1139_v14 }
 0x2ce   :  { %1058 = vmatpush.msra.mxu2 %v1034_v24  ;;  %1091 = vmatpush.msra.mxu3 %v1070_v49 }
 0x2cf   :  { %957 = vmatpush.msrb.mxu0 %v2919_v31 }
 0x2d0   :  { %1059 = vmatpush.msra.mxu2 %v1033_v6  ;;  %1092 = vmatpush.msra.mxu3 %v1069_v13 }
 0x2d1   :  { %958 = vmatpush.msrb.mxu0 %v2920_v32 }
 0x2d2   :  { %915 = vmatmul.f32.vlgmr.msra.gmra.mxu1 %v798_v62  ;;  %1060 = vmatpush.msra.mxu2 %v1032_v0 }
 0x2d3   :  { %959 = vmatpush.msrb.mxu0 %v2921_v45  ;;  %1093 = vmatpush.msra.mxu3 %v1068_v43 }
 0x2d4   :  { %1061 = vmatpush.msra.mxu2 %v1031_v2 }
 0x2d5   :  { %960 = vmatpush.msrb.mxu0 %v1949_v53  ;;  %1094 = vmatpush.msra.mxu3 %v1067_v1 }
 0x2d7   :  { %961 = vmatpush.msrb.mxu0 %v1956_v20 }
 0x2d9   :  { %962 = vmatpush.msrb.mxu0 %v1965_v47 }
 0x2db   :  { %963 = vmatpush.msrb.mxu0 %v2009_v12 }
 0x2dd   :  { %964 = vmatpush.msrb.mxu0 %v2021_v35 }
 0x2df   :  { %965 = vmatpush.msrb.mxu0 %v2033_v40 }
 0x2e1   :  { %966 = vmatpush.msrb.mxu0 %v2045_v52 }
 0x33f   :  { %v744_v63 = vpop.f32.mrf.mxu0  ;;  %v816_v20 = vpop.f32.mrf.mxu3 }
 0x340   :  { %v2505_v53 = vadd.f32 %v744_v63, %v468_v44  ;;  %v856_v36 = vpop.f32.mrf.mxu2  ;;  %v817_v47 = vadd.f32 %v816_v20, %v2106_v4  ;;  %v1075_v44 = vld [vmem:[%s2612_s7 + $0x5] ss:$0 sm:$0xff] }
 0x341   :  { %v857_v12 = vadd.f32 %v856_v36, %v2927_v34 }
 0x347   :  { %v836_v35 = vpop.f32.mrf.mxu1  ;;  %v876_v55 = vpop.f32.mrf.mxu0 }
 0x348   :  { %v837_v40 = vadd.f32 %v836_v35, %v817_v47  ;;  %v877_v57 = vadd.f32 %v876_v55, %v857_v12  ;;  %v896_v39 = vpop.f32.mrf.mxu3 }
 0x349   :  { %v897_v32 = vadd.f32 %v896_v39, %v2122_v59  ;;  %v1138_v59 = vld [vmem:[%s2613_s4 + $0xa8] sm:$0xff] }
 0x34a   :  { %vm919_vm2 = vcmp.gt.f32.partialorder %v837_v40, 0.0  ;;  %v922_v52 = vmul.f32 0.01, %v837_v40  ;;  %vm920_vm3 = vcmp.gt.f32.partialorder %v877_v57, 0.0  ;;  %v923_v15 = vmul.f32 0.01, %v877_v57  ;;  %1016 = vmatpush.msrb.mxu1 %v1138_v59 }
 0x34c   :  { %v925_v51 = vsel %vm919_vm2, %v837_v40, %v922_v52  ;;  %v926_v31 = vsel %vm920_vm3, %v877_v57, %v923_v15  ;;  %1017 = vmatpush.msrb.mxu1 %v1137_v60 }
 0x34d   :  { %947 = vmatmul.f32.vlgmr.msrb.gmra.mxu2 %v925_v51  ;;  %967 = vmatmul.f32.vlgmr.msrb.gmra.mxu0 %v926_v31 }
 0x34e   :  { %1018 = vmatpush.msrb.mxu1 %v1136_v22 }
 0x34f   :  { %v916_v45 = vpop.f32.mrf.mxu1 }
 0x350   :  { %v917_v7 = vadd.f32 %v916_v45, %v897_v32  ;;  %1019 = vmatpush.msrb.mxu1 %v1135_v42 }
 0x352   :  { %vm921_vm4 = vcmp.gt.f32.partialorder %v917_v7, 0.0  ;;  %v924_v4 = vmul.f32 0.01, %v917_v7  ;;  %1020 = vmatpush.msrb.mxu1 %v1134_v28 }
 0x354   :  { %v927_v34 = vsel %vm921_vm4, %v917_v7, %v924_v4  ;;  %1021 = vmatpush.msrb.mxu1 %v1133_v19 }
 0x355   :  { %1132 = vmatmul.msk.f32.vlgmr.msrb.gmra.mxu3 %vm369_vm7, %v927_v34  ;;  %vm1043_vm7 = vcmask 785408  }
 0x3ca   :  { %v968_v38 = vpop.f32.mrf.mxu0 }
 0x3d0   :  { %v948_v8 = vpop.f32.mrf.mxu2 }
 0x3d1   :  { %v949_v30 = vadd.f32 %v948_v8, %v2222_v25  ;;  %v1030_v25 = vld [vmem:[%s2614_s5] sm:$0xff] }
 0x3d2   :  { %1062 = vmatpush.msra.mxu2 %v1030_v25 }
 0x3d3   :  { %v969_v46 = vadd.f32 %v968_v38, %v949_v30 }
 0x3d8   :  { %v988_v18 = vpop.f32.mrf.mxu3 }
 0x3d9   :  { %v989_v56 = vadd.f32 %v988_v18, %v969_v46 }
 0x3db   :  { %vm991_vm5 = vcmp.gt.f32.partialorder %v989_v56, 0.0  ;;  %v992_v10 = vmul.f32 0.01, %v989_v56 }
 0x3dd   :  { %v993_v48 = vsel %vm991_vm5, %v989_v56, %v992_v10 }
 0x3de   :  { %1141 = vmatmul.msk.f32.vlgmr.msrb.gmra.mxu1 %vm444_vm10, %v993_v48 }
 0x45b   :  { %v1023_v16 = vpop.f32.mrf.mxu1 }
 0x45c   :  { %v1026_v33 = vadd.f32 %v1023_v16, %v2505_v53 }
 0x45e   :  { %vm1027_vm6 = vcmp.gt.f32.partialorder %v1026_v33, 0.0  ;;  %v1028_v21 = vmul.f32 0.01, %v1026_v33 }
 0x460   :  { %v1029_v58 = vsel %vm1027_vm6, %v1026_v33, %v1028_v21 }
 0x461   :  { %1142 = vmatmul.msk.f32.vlgmr.msra.gmra.mxu2 %vm1043_vm7, %v1029_v58 }
 0x4e4   :  { %v1064_v62 = vpop.f32.mrf.mxu2 }
 0x4e5   :  { %v1065_v29 = vadd.f32 %v1064_v62, %v1042_v61 }
 0x4e7   :  { %1143 = vmatmul.msk.f32.vlgmr.msra.gmra.mxu3 %vm444_vm10, %v1065_v29 }
 0x56a   :  { %v1096_v63 = vpop.f32.mrf.mxu3 }
 0x56b   :  { %v1097_v53 = vadd.f32 %v1096_v63, %v1075_v44 }
 0x56d   :  { %1100 = vst.msk [vmem:[%s2616_s8] sm:$0xff] %vm1099_vm8, %v1097_v53 }

</bundles_post_ra>
